<compile_context>
chip_gen: v7x
topology: tpu7x:2x2x1
jax: 0.10.0
libtpu: 0.0.40
codegen_flags: <defaults>
</compile_context>

<pallas_src>
import functools

import jax
import jax.numpy as jnp
from jax import lax
from jax.experimental import pallas as pl
from jax.experimental.pallas import tpu as pltpu

LEAKY_SLOPE = 0.2
BN_EPS = 1e-5
_STATS_CORES = 2                      # leading parallel axis for v7x megacore
_VMEM_LIMIT = 48 * 1024 * 1024        # fits v7x (64 MiB physical) with headroom


def _leaky_relu(x):
    # Valid for 0 < slope < 1: max(x, slope*x) == leaky_relu(x).
    return jnp.maximum(x, LEAKY_SLOPE * x)


def _conv1(x_ref, w1_ref, b1_ref):
    """conv1 + LeakyReLU on the MXU: (ndf, Cin_pad)@(Cin_pad, T) -> (ndf, T) f32."""
    h1 = jnp.dot(w1_ref[...], x_ref[...], preferred_element_type=jnp.float32)
    return _leaky_relu(h1 + b1_ref[...])


def _stats_kernel(x_ref, w1_ref, b1_ref, s_ref, g_ref,
                  *, p_tile, p_valid, tiles_per_core, need_mask):
    """Pass 1: accumulate s = sum_p h1 and Gram G = h1 @ h1^T per core."""
    c = pl.program_id(0)
    i = pl.program_id(1)

    @pl.when(i == 0)
    def _():
        s_ref[...] = jnp.zeros_like(s_ref)
        g_ref[...] = jnp.zeros_like(g_ref)

    h1 = _conv1(x_ref, w1_ref, b1_ref)                       # (ndf, T) f32

    if need_mask:
        # Zero the zero-padded pixels (h1 of padded pixels is leaky(b1) != 0).
        idx = (c * tiles_per_core + i) * p_tile + lax.broadcasted_iota(
            jnp.int32, (1, p_tile), 1)
        h1 = jnp.where(idx < p_valid, h1, 0.0)

    s_ref[...] += jnp.sum(h1, axis=1, keepdims=True)         # (ndf, 1)
    h1b = h1.astype(jnp.bfloat16)
    # Gram matrix on the MXU (contract the pixel axis of both operands).
    g_ref[...] += lax.dot_general(
        h1b, h1b, dimension_numbers=(((1,), (1,)), ((), ())),
        preferred_element_type=jnp.float32)                  # (ndf, ndf)


def _apply_kernel(x_ref, w1_ref, b1_ref, w2f_ref, shift_ref, w3t_ref, o_ref):
    """Pass 2: conv1 -> conv2(BN-scale folded) + shift -> LeakyReLU -> conv3 -> sigmoid."""
    h1 = _conv1(x_ref, w1_ref, b1_ref)                       # (ndf, T) f32

    # conv2 with BN scale folded into the weights; only the shift add remains.
    h2 = jnp.dot(w2f_ref[...], h1.astype(jnp.bfloat16),
                 preferred_element_type=jnp.float32)         # (2*ndf, T) f32
    h2n = _leaky_relu(h2 + shift_ref[...])

    # conv3 (Cout=1) on the MXU -> lane-dense (1, T) output tile.
    logits = jnp.dot(w3t_ref[...], h2n.astype(jnp.bfloat16),
                     preferred_element_type=jnp.float32)     # (1, T)
    logits = jnp.clip(logits, -30.0, 30.0)                   # guard exp overflow

    # Sigmoid: EUP exp + approx EUP reciprocal (keeps the VPU out of the epilogue).
    o_ref[...] = pl.reciprocal(1.0 + jnp.exp(-logits),
                               approx=True).astype(o_ref.dtype)


def pixel_discriminator(x_nchw, params, *, p_tile_max=8192):
    """x_nchw: (N, Cin, H, W) float32. Returns (N, 1, H, W) float32."""
    w1, b1, w2, gamma, beta, w3 = params
    N, Cin, H, W = x_nchw.shape
    ndf = w1.shape[0]
    cout = w2.shape[0]
    P = N * H * W

    # NCHW -> (Cin, P): channels on sublanes, pixels on the fast lane axis.
    x_t = jnp.transpose(x_nchw, (1, 0, 2, 3)).reshape(Cin, P)

    # Pad the (tiny) channel axis to a sublane multiple so conv1's MXU dot has
    # a clean contraction dim; zero channels contribute nothing.
    cin_pad = max(8, ((Cin + 7) // 8) * 8)
    if cin_pad != Cin:
        x_t = jnp.pad(x_t, ((0, cin_pad - Cin), (0, 0)))
    x_t = x_t.astype(jnp.bfloat16)                           # halve input DMA bytes

    # Pixel tiling: multiple of 128 lanes, capped; pad so the (core, tile) grid
    # of pass 1 covers the whole (padded) pixel range.
    p_tile = min(p_tile_max, pl.cdiv(P, 128) * 128)
    tiles_per_core = pl.cdiv(pl.cdiv(P, p_tile), _STATS_CORES)
    n_tiles = tiles_per_core * _STATS_CORES
    p_pad = n_tiles * p_tile
    if p_pad != P:
        x_t = jnp.pad(x_t, ((0, 0), (0, p_pad - P)))

    w1_bf = jnp.pad(w1, ((0, 0), (0, cin_pad - Cin))).astype(jnp.bfloat16)

    # ---- pass 1: per-channel sum of h1 and Gram(h1) over all pixels ----------
    x_spec_stats = pl.BlockSpec((cin_pad, p_tile),
                                lambda c, i: (0, c * tiles_per_core + i))

    def full2(shape):
        return pl.BlockSpec(shape, lambda c, i: (0, 0))

    s_parts, g_parts = pl.pallas_call(
        functools.partial(_stats_kernel, p_tile=p_tile, p_valid=P,
                          tiles_per_core=tiles_per_core, need_mask=(p_pad != P)),
        grid=(_STATS_CORES, tiles_per_core),
        in_specs=[x_spec_stats, full2((ndf, cin_pad)), full2((ndf, 1))],
        out_specs=[pl.BlockSpec((None, ndf, 1), lambda c, i: (c, 0, 0)),
                   pl.BlockSpec((None, ndf, ndf), lambda c, i: (c, 0, 0))],
        out_shape=[jax.ShapeDtypeStruct((_STATS_CORES, ndf, 1), jnp.float32),
                   jax.ShapeDtypeStruct((_STATS_CORES, ndf, ndf), jnp.float32)],
        compiler_params=pltpu.CompilerParams(
            dimension_semantics=("parallel", "arbitrary"),
            vmem_limit_bytes=_VMEM_LIMIT),
    )(x_t, w1_bf, b1)

    s_h1 = jnp.sum(s_parts, axis=0)                          # (ndf, 1)
    g_h1 = jnp.sum(g_parts, axis=0)                          # (ndf, ndf)

    # ---- finalize BN (training-mode batch stats, biased variance) in f32 -----
    inv_p = 1.0 / float(P)
    mean = (w2 @ s_h1) * inv_p                               # (cout, 1)
    e_sq = jnp.sum((w2 @ g_h1) * w2, axis=1, keepdims=True) * inv_p
    var = jnp.maximum(e_sq - mean * mean, 0.0)
    rstd = lax.rsqrt(var + BN_EPS)
    scale = gamma * rstd
    shift = beta - mean * scale

    # Fold the BN scale into conv2 weights (conv2 has no bias, so exact).
    w2_folded = (w2 * scale).astype(jnp.bfloat16)            # (cout, ndf)
    w3t_bf = w3.T.astype(jnp.bfloat16)                       # (1, cout)

    # ---- pass 2: normalize + LeakyReLU + conv3 + sigmoid, lane-dense output --
    x_spec = pl.BlockSpec((cin_pad, p_tile), lambda i: (0, i))

    def full1(shape):
        return pl.BlockSpec(shape, lambda i: (0, 0))

    out_flat = pl.pallas_call(
        _apply_kernel,
        grid=(n_tiles,),
        in_specs=[x_spec, full1((ndf, cin_pad)), full1((ndf, 1)),
                  full1((cout, ndf)), full1((cout, 1)), full1((1, cout))],
        out_specs=pl.BlockSpec((1, p_tile), lambda i: (0, i)),
        out_shape=jax.ShapeDtypeStruct((1, p_pad), jnp.float32),
        compiler_params=pltpu.CompilerParams(
            dimension_semantics=("parallel",),
            vmem_limit_bytes=_VMEM_LIMIT),
    )(x_t, w1_bf, b1, w2_folded, shift, w3t_bf)

    # (1, P) -> (N, 1, H, W)
    out = out_flat[:, :P].reshape(1, N, H, W)
    return jnp.transpose(out, (1, 0, 2, 3))


def pixel_discriminator_ref(x_nchw, params):
    """Pure-JAX f32 reference (same math, un-tiled)."""
    w1, b1, w2, gamma, beta, w3 = params
    N, Cin, H, W = x_nchw.shape
    x = jnp.transpose(x_nchw, (1, 0, 2, 3)).reshape(Cin, -1)    # (Cin, P)
    h1 = jnp.where(w1 @ x + b1 >= 0, w1 @ x + b1, LEAKY_SLOPE * (w1 @ x + b1))
    h2 = w2 @ h1
    mean = jnp.mean(h2, axis=1, keepdims=True)
    var = jnp.mean((h2 - mean) ** 2, axis=1, keepdims=True)
    h2a = (h2 - mean) * jax.lax.rsqrt(var + BN_EPS) * gamma + beta
    h2n = jnp.where(h2a >= 0, h2a, LEAKY_SLOPE * h2a)
    logits = jnp.sum(w3 * h2n, axis=0, keepdims=True)           # (1, P)
    out = jax.nn.sigmoid(logits)
    return jnp.transpose(out.reshape(1, N, H, W), (1, 0, 2, 3))


def init_params(key, input_nc, ndf):
    """Deterministic synthetic parameters (shapes match the PyTorch module).

    Conv weights are stored as (Cout, Cin) (PyTorch layout, squeezed 1x1);
    w3 is stored as (2*ndf, 1).  gamma/beta are randomized (PyTorch init would
    be ones/zeros) so the BN affine path is actually exercised by the test.
    """
    k1, k2, k3, kb1, kg, kbt = jax.random.split(key, 6)
    w1 = jax.random.uniform(k1, (ndf, input_nc), jnp.float32, -0.5, 0.5)
    b1 = jax.random.uniform(kb1, (ndf, 1), jnp.float32, -0.1, 0.1)
    w2 = jax.random.uniform(k2, (2 * ndf, ndf), jnp.float32, -0.1, 0.1)
    gamma = jax.random.uniform(kg, (2 * ndf, 1), jnp.float32, 0.5, 1.5)
    beta = jax.random.uniform(kbt, (2 * ndf, 1), jnp.float32, -0.1, 0.1)
    w3 = jax.random.uniform(k3, (2 * ndf, 1), jnp.float32, -0.1, 0.1)
    return (w1, b1, w2, gamma, beta, w3)


if __name__ == "__main__":
    key = jax.random.PRNGKey(0)
    kx, kp = jax.random.split(key)

    N, input_nc, H, W = 2, 4, 16, 16
    ndf = 64

    x = jax.random.normal(kx, (N, input_nc, H, W), jnp.float32)
    params = init_params(kp, input_nc, ndf)

    fwd = jax.jit(pixel_discriminator)
    out = jax.block_until_ready(fwd(x, params))
    ref = jax.block_until_ready(pixel_discriminator_ref(x, params))

    assert out.shape == (N, 1, H, W), out.shape
    assert bool(jnp.all(jnp.isfinite(out)))
    max_err = float(jnp.max(jnp.abs(out - ref)))
    assert max_err < 2e-2, f"max |kernel - ref| = {max_err}"
    print("KERNEL_OK")
</pallas_src>

<mosaic_0001>
module attributes {stable_mosaic.version = 11 : i64} {
  func.func @_stats_kernel(%arg0: i32, %arg1: i32, %arg2: memref<8x512xbf16, #tpu.memory_space<vmem>>, %arg3: memref<64x8xbf16, #tpu.memory_space<vmem>>, %arg4: memref<64x1xf32, #tpu.memory_space<vmem>>, %arg5: memref<1x64x1xf32, #tpu.memory_space<vmem>>, %arg6: memref<1x64x64xf32, #tpu.memory_space<vmem>>) attributes {dimension_semantics = [#tpu.dimension_semantics<parallel>, #tpu.dimension_semantics<arbitrary>], iteration_bounds = array<i64: 2, 1>, scalar_prefetch = 0 : i64, scratch_operands = 0 : i64, tpu.core_type = #tpu.core_type<tc>, window_params = [{transform_indices = @transform_0, window_bounds = array<i64: 8, 512>}, {pipeline_mode = #tpu.pipeline_mode<synchronous>, transform_indices = @transform_1, window_bounds = array<i64: 64, 8>}, {pipeline_mode = #tpu.pipeline_mode<synchronous>, transform_indices = @transform_2, window_bounds = array<i64: 64, 1>}, {transform_indices = @transform_3, window_bounds = array<i64: 1, 64, 1>}, {transform_indices = @transform_4, window_bounds = array<i64: 1, 64, 64>}]} {
    %c0_i32 = arith.constant 0 : i32
    %0 = arith.cmpi eq, %arg1, %c0_i32 : i32
    %1 = arith.extui %0 : i1 to i32
    %c0_i32_0 = arith.constant 0 : i32
    %2 = arith.cmpi ne, %1, %c0_i32_0 : i32
    scf.if %2 {
      %cst_23 = arith.constant 0.000000e+00 : f32
      %40 = vector.broadcast %cst_23 : f32 to vector<64x1xf32>
      %c0_24 = arith.constant 0 : index
      %c0_25 = arith.constant 0 : index
      %c0_26 = arith.constant 0 : index
      %41 = vector.load %arg5[%c0_24, %c0_25, %c0_26] : memref<1x64x1xf32, #tpu.memory_space<vmem>>, vector<1x64x1xf32>
      %42 = vector.shape_cast %41 : vector<1x64x1xf32> to vector<64x1xf32>
      %43 = vector.shape_cast %40 : vector<64x1xf32> to vector<1x64x1xf32>
      tpu.vector_store %arg5[%c0_24, %c0_25, %c0_26], %43 {strides = array<i32>} : memref<1x64x1xf32, #tpu.memory_space<vmem>>, vector<1x64x1xf32>,
      %cst_27 = arith.constant 0.000000e+00 : f32
      %44 = vector.broadcast %cst_27 : f32 to vector<64x64xf32>
      %c0_28 = arith.constant 0 : index
      %c0_29 = arith.constant 0 : index
      %c0_30 = arith.constant 0 : index
      %45 = vector.load %arg6[%c0_28, %c0_29, %c0_30] : memref<1x64x64xf32, #tpu.memory_space<vmem>>, vector<1x64x64xf32>
      %46 = vector.shape_cast %45 : vector<1x64x64xf32> to vector<64x64xf32>
      %47 = vector.shape_cast %44 : vector<64x64xf32> to vector<1x64x64xf32>
      tpu.vector_store %arg6[%c0_28, %c0_29, %c0_30], %47 {strides = array<i32>} : memref<1x64x64xf32, #tpu.memory_space<vmem>>, vector<1x64x64xf32>,
    } else {
    }
    %c0 = arith.constant 0 : index
    %c0_1 = arith.constant 0 : index
    %3 = vector.load %arg3[%c0, %c0_1] : memref<64x8xbf16, #tpu.memory_space<vmem>>, vector<64x8xbf16>
    %c0_2 = arith.constant 0 : index
    %c0_3 = arith.constant 0 : index
    %4 = vector.load %arg2[%c0_2, %c0_3] : memref<8x512xbf16, #tpu.memory_space<vmem>>, vector<8x512xbf16>
    %cst = arith.constant dense<0.000000e+00> : vector<64x512xf32>
    %5 = tpu.matmul %3, %4, %cst {dimension_numbers = #tpu.dot_dimension_numbers<[1], [0], [0], [1], [0, 0, 1, 1], [], []>} : vector<64x8xbf16>, vector<8x512xbf16>, vector<64x512xf32> -> vector<64x512xf32>
    %c0_4 = arith.constant 0 : index
    %c0_5 = arith.constant 0 : index
    %6 = vector.load %arg4[%c0_4, %c0_5] : memref<64x1xf32, #tpu.memory_space<vmem>>, vector<64x1xf32>
    %7 = vector.broadcast %6 : vector<64x1xf32> to vector<64x512xf32>
    %8 = arith.addf %5, %7 : vector<64x512xf32>
    %cst_6 = arith.constant 2.000000e-01 : f32
    %9 = vector.broadcast %cst_6 : f32 to vector<64x512xf32>
    %10 = arith.mulf %9, %8 : vector<64x512xf32>
    %11 = arith.maximumf %8, %10 : vector<64x512xf32>
    %c1_i32 = arith.constant 1 : i32
    %12 = arith.muli %arg0, %c1_i32 : i32
    %13 = arith.addi %12, %arg1 : i32
    %c512_i32 = arith.constant 512 : i32
    %14 = arith.muli %13, %c512_i32 : i32
    %15 = tpu.iota {dimensions = array<i32: 1>} : vector<1x512xi32>
    %16 = vector.broadcast %14 : i32 to vector<1x512xi32>
    %17 = arith.addi %16, %15 : vector<1x512xi32>
    %c512_i32_7 = arith.constant 512 : i32
    %18 = vector.broadcast %c512_i32_7 : i32 to vector<1x512xi32>
    %19 = arith.cmpi slt, %17, %18 : vector<1x512xi32>
    %cst_8 = arith.constant 0.000000e+00 : f32
    %20 = vector.shape_cast %19 : vector<1x512xi1> to vector<1x512xi1>
    %21 = vector.broadcast %20 : vector<1x512xi1> to vector<64x512xi1>
    %22 = vector.broadcast %cst_8 : f32 to vector<64x512xf32>
    %23 = arith.select %21, %11, %22 : vector<64x512xi1>, vector<64x512xf32>
    %c0_9 = arith.constant 0 : index
    %c0_10 = arith.constant 0 : index
    %c0_11 = arith.constant 0 : index
    %24 = vector.load %arg5[%c0_9, %c0_10, %c0_11] : memref<1x64x1xf32, #tpu.memory_space<vmem>>, vector<1x64x1xf32>
    %25 = vector.shape_cast %24 : vector<1x64x1xf32> to vector<64x1xf32>
    %cst_12 = arith.constant dense<0.000000e+00> : vector<64xf32>
    %26 = vector.multi_reduction <add>, %23, %cst_12 [1] : vector<64x512xf32> to vector<64xf32>
    %27 = vector.shape_cast %26 : vector<64xf32> to vector<64x1xf32>
    %28 = arith.addf %25, %27 : vector<64x1xf32>
    %c0_13 = arith.constant 0 : index
    %c0_14 = arith.constant 0 : index
    %c0_15 = arith.constant 0 : index
    %29 = vector.load %arg5[%c0_13, %c0_14, %c0_15] : memref<1x64x1xf32, #tpu.memory_space<vmem>>, vector<1x64x1xf32>
    %30 = vector.shape_cast %29 : vector<1x64x1xf32> to vector<64x1xf32>
    %31 = vector.shape_cast %28 : vector<64x1xf32> to vector<1x64x1xf32>
    tpu.vector_store %arg5[%c0_13, %c0_14, %c0_15], %31 {strides = array<i32>} : memref<1x64x1xf32, #tpu.memory_space<vmem>>, vector<1x64x1xf32>,
    %32 = arith.truncf %23 : vector<64x512xf32> to vector<64x512xbf16>
    %c0_16 = arith.constant 0 : index
    %c0_17 = arith.constant 0 : index
    %c0_18 = arith.constant 0 : index
    %33 = vector.load %arg6[%c0_16, %c0_17, %c0_18] : memref<1x64x64xf32, #tpu.memory_space<vmem>>, vector<1x64x64xf32>
    %34 = vector.shape_cast %33 : vector<1x64x64xf32> to vector<64x64xf32>
    %cst_19 = arith.constant dense<0.000000e+00> : vector<64x64xf32>
    %35 = tpu.matmul %32, %32, %cst_19 {dimension_numbers = #tpu.dot_dimension_numbers<[1], [1], [0], [0], [0, 0, 1, 0], [], []>} : vector<64x512xbf16>, vector<64x512xbf16>, vector<64x64xf32> -> vector<64x64xf32>
    %36 = arith.addf %34, %35 : vector<64x64xf32>
    %c0_20 = arith.constant 0 : index
    %c0_21 = arith.constant 0 : index
    %c0_22 = arith.constant 0 : index
    %37 = vector.load %arg6[%c0_20, %c0_21, %c0_22] : memref<1x64x64xf32, #tpu.memory_space<vmem>>, vector<1x64x64xf32>
    %38 = vector.shape_cast %37 : vector<1x64x64xf32> to vector<64x64xf32>
    %39 = vector.shape_cast %36 : vector<64x64xf32> to vector<1x64x64xf32>
    tpu.vector_store %arg6[%c0_20, %c0_21, %c0_22], %39 {strides = array<i32>} : memref<1x64x64xf32, #tpu.memory_space<vmem>>, vector<1x64x64xf32>,
    return
  }
  func.func @transform_0(%arg0: i32, %arg1: i32) -> (i32, i32) {
    %c1_i32 = arith.constant 1 : i32
    %0 = arith.muli %arg0, %c1_i32 : i32
    %1 = arith.addi %0, %arg1 : i32
    %c0_i32 = arith.constant 0 : i32
    %c0_i32_0 = arith.constant 0 : i32
    return %c0_i32, %1 : i32, i32
  }
  func.func @transform_1(%arg0: i32, %arg1: i32) -> (i32, i32) {
    %c0_i32 = arith.constant 0 : i32
    %c0_i32_0 = arith.constant 0 : i32
    %c0_i32_1 = arith.constant 0 : i32
    return %c0_i32, %c0_i32_0 : i32, i32
  }
  func.func @transform_2(%arg0: i32, %arg1: i32) -> (i32, i32) {
    %c0_i32 = arith.constant 0 : i32
    %c0_i32_0 = arith.constant 0 : i32
    %c0_i32_1 = arith.constant 0 : i32
    return %c0_i32, %c0_i32_0 : i32, i32
  }
  func.func @transform_3(%arg0: i32, %arg1: i32) -> (i32, i32, i32) {
    %c0_i32 = arith.constant 0 : i32
    %c0_i32_0 = arith.constant 0 : i32
    %c0_i32_1 = arith.constant 0 : i32
    return %arg0, %c0_i32, %c0_i32_0 : i32, i32, i32
  }
  func.func @transform_4(%arg0: i32, %arg1: i32) -> (i32, i32, i32) {
    %c0_i32 = arith.constant 0 : i32
    %c0_i32_0 = arith.constant 0 : i32
    %c0_i32_1 = arith.constant 0 : i32
    return %arg0, %c0_i32, %c0_i32_0 : i32, i32, i32
  }
}

module attributes {stable_mosaic.version = 11 : i64} {
  func.func @_apply_kernel(%arg0: i32, %arg1: memref<8x512xbf16, #tpu.memory_space<vmem>>, %arg2: memref<64x8xbf16, #tpu.memory_space<vmem>>, %arg3: memref<64x1xf32, #tpu.memory_space<vmem>>, %arg4: memref<128x64xbf16, #tpu.memory_space<vmem>>, %arg5: memref<128x1xf32, #tpu.memory_space<vmem>>, %arg6: memref<1x128xbf16, #tpu.memory_space<vmem>>, %arg7: memref<1x512xf32, #tpu.memory_space<vmem>>) attributes {dimension_semantics = [#tpu.dimension_semantics<parallel>], iteration_bounds = array<i64: 2>, scalar_prefetch = 0 : i64, scratch_operands = 0 : i64, tpu.core_type = #tpu.core_type<tc>, window_params = [{transform_indices = @transform_0, window_bounds = array<i64: 8, 512>}, {pipeline_mode = #tpu.pipeline_mode<synchronous>, transform_indices = @transform_1, window_bounds = array<i64: 64, 8>}, {pipeline_mode = #tpu.pipeline_mode<synchronous>, transform_indices = @transform_2, window_bounds = array<i64: 64, 1>}, {pipeline_mode = #tpu.pipeline_mode<synchronous>, transform_indices = @transform_3, window_bounds = array<i64: 128, 64>}, {pipeline_mode = #tpu.pipeline_mode<synchronous>, transform_indices = @transform_4, window_bounds = array<i64: 128, 1>}, {pipeline_mode = #tpu.pipeline_mode<synchronous>, transform_indices = @transform_5, window_bounds = array<i64: 1, 128>}, {transform_indices = @transform_6, window_bounds = array<i64: 1, 512>}]} {
    %c0 = arith.constant 0 : index
    %c0_0 = arith.constant 0 : index
    %0 = vector.load %arg2[%c0, %c0_0] : memref<64x8xbf16, #tpu.memory_space<vmem>>, vector<64x8xbf16>
    %c0_1 = arith.constant 0 : index
    %c0_2 = arith.constant 0 : index
    %1 = vector.load %arg1[%c0_1, %c0_2] : memref<8x512xbf16, #tpu.memory_space<vmem>>, vector<8x512xbf16>
    %cst = arith.constant dense<0.000000e+00> : vector<64x512xf32>
    %2 = tpu.matmul %0, %1, %cst {dimension_numbers = #tpu.dot_dimension_numbers<[1], [0], [0], [1], [0, 0, 1, 1], [], []>} : vector<64x8xbf16>, vector<8x512xbf16>, vector<64x512xf32> -> vector<64x512xf32>
    %c0_3 = arith.constant 0 : index
    %c0_4 = arith.constant 0 : index
    %3 = vector.load %arg3[%c0_3, %c0_4] : memref<64x1xf32, #tpu.memory_space<vmem>>, vector<64x1xf32>
    %4 = vector.broadcast %3 : vector<64x1xf32> to vector<64x512xf32>
    %5 = arith.addf %2, %4 : vector<64x512xf32>
    %cst_5 = arith.constant 2.000000e-01 : f32
    %6 = vector.broadcast %cst_5 : f32 to vector<64x512xf32>
    %7 = arith.mulf %6, %5 : vector<64x512xf32>
    %8 = arith.maximumf %5, %7 : vector<64x512xf32>
    %c0_6 = arith.constant 0 : index
    %c0_7 = arith.constant 0 : index
    %9 = vector.load %arg4[%c0_6, %c0_7] : memref<128x64xbf16, #tpu.memory_space<vmem>>, vector<128x64xbf16>
    %10 = arith.truncf %8 : vector<64x512xf32> to vector<64x512xbf16>
    %cst_8 = arith.constant dense<0.000000e+00> : vector<128x512xf32>
    %11 = tpu.matmul %9, %10, %cst_8 {dimension_numbers = #tpu.dot_dimension_numbers<[1], [0], [0], [1], [0, 0, 1, 1], [], []>} : vector<128x64xbf16>, vector<64x512xbf16>, vector<128x512xf32> -> vector<128x512xf32>
    %c0_9 = arith.constant 0 : index
    %c0_10 = arith.constant 0 : index
    %12 = vector.load %arg5[%c0_9, %c0_10] : memref<128x1xf32, #tpu.memory_space<vmem>>, vector<128x1xf32>
    %13 = vector.broadcast %12 : vector<128x1xf32> to vector<128x512xf32>
    %14 = arith.addf %11, %13 : vector<128x512xf32>
    %cst_11 = arith.constant 2.000000e-01 : f32
    %15 = vector.broadcast %cst_11 : f32 to vector<128x512xf32>
    %16 = arith.mulf %15, %14 : vector<128x512xf32>
    %17 = arith.maximumf %14, %16 : vector<128x512xf32>
    %c0_12 = arith.constant 0 : index
    %c0_13 = arith.constant 0 : index
    %18 = vector.load %arg6[%c0_12, %c0_13] : memref<1x128xbf16, #tpu.memory_space<vmem>>, vector<1x128xbf16>
    %19 = arith.truncf %17 : vector<128x512xf32> to vector<128x512xbf16>
    %cst_14 = arith.constant dense<0.000000e+00> : vector<1x512xf32>
    %20 = tpu.matmul %18, %19, %cst_14 {dimension_numbers = #tpu.dot_dimension_numbers<[1], [0], [0], [1], [0, 0, 1, 1], [], []>} : vector<1x128xbf16>, vector<128x512xbf16>, vector<1x512xf32> -> vector<1x512xf32>
    %cst_15 = arith.constant -3.000000e+01 : f32
    %cst_16 = arith.constant 3.000000e+01 : f32
    %21 = vector.broadcast %cst_15 : f32 to vector<1x512xf32>
    %22 = arith.maximumf %21, %20 : vector<1x512xf32>
    %23 = vector.broadcast %cst_16 : f32 to vector<1x512xf32>
    %24 = arith.minimumf %23, %22 : vector<1x512xf32>
    %cst_17 = arith.constant 0.000000e+00 : f32
    %25 = vector.broadcast %cst_17 : f32 to vector<1x512xf32>
    %26 = arith.subf %25, %24 : vector<1x512xf32>
    %27 = math.exp %26 : vector<1x512xf32>
    %cst_18 = arith.constant 1.000000e+00 : f32
    %28 = vector.broadcast %cst_18 : f32 to vector<1x512xf32>
    %29 = arith.addf %28, %27 : vector<1x512xf32>
    %30 = tpu.reciprocal %29 {approx = true} : vector<1x512xf32> -> vector<1x512xf32>
    %c0_19 = arith.constant 0 : index
    %c0_20 = arith.constant 0 : index
    %31 = vector.load %arg7[%c0_19, %c0_20] : memref<1x512xf32, #tpu.memory_space<vmem>>, vector<1x512xf32>
    tpu.vector_store %arg7[%c0_19, %c0_20], %30 {strides = array<i32>} : memref<1x512xf32, #tpu.memory_space<vmem>>, vector<1x512xf32>,
    return
  }
  func.func @transform_0(%arg0: i32) -> (i32, i32) {
    %c0_i32 = arith.constant 0 : i32
    %c0_i32_0 = arith.constant 0 : i32
    return %c0_i32, %arg0 : i32, i32
  }
  func.func @transform_1(%arg0: i32) -> (i32, i32) {
    %c0_i32 = arith.constant 0 : i32
    %c0_i32_0 = arith.constant 0 : i32
    %c0_i32_1 = arith.constant 0 : i32
    return %c0_i32, %c0_i32_0 : i32, i32
  }
  func.func @transform_2(%arg0: i32) -> (i32, i32) {
    %c0_i32 = arith.constant 0 : i32
    %c0_i32_0 = arith.constant 0 : i32
    %c0_i32_1 = arith.constant 0 : i32
    return %c0_i32, %c0_i32_0 : i32, i32
  }
  func.func @transform_3(%arg0: i32) -> (i32, i32) {
    %c0_i32 = arith.constant 0 : i32
    %c0_i32_0 = arith.constant 0 : i32
    %c0_i32_1 = arith.constant 0 : i32
    return %c0_i32, %c0_i32_0 : i32, i32
  }
  func.func @transform_4(%arg0: i32) -> (i32, i32) {
    %c0_i32 = arith.constant 0 : i32
    %c0_i32_0 = arith.constant 0 : i32
    %c0_i32_1 = arith.constant 0 : i32
    return %c0_i32, %c0_i32_0 : i32, i32
  }
  func.func @transform_5(%arg0: i32) -> (i32, i32) {
    %c0_i32 = arith.constant 0 : i32
    %c0_i32_0 = arith.constant 0 : i32
    %c0_i32_1 = arith.constant 0 : i32
    return %c0_i32, %c0_i32_0 : i32, i32
  }
  func.func @transform_6(%arg0: i32) -> (i32, i32) {
    %c0_i32 = arith.constant 0 : i32
    %c0_i32_0 = arith.constant 0 : i32
    return %c0_i32, %arg0 : i32, i32
  }
}

</mosaic_0001>

<bundles_post_ra>
// kernel: pixel_discriminator.2
= control target key start
LH: loop header
LB: loop body
LE: loop exit
PB: predicated region body
PF: predicated region fallthrough
CT: control target
= control target key end

     0   :  { %s1184_s15 = smov 0   ;;  %s1186_s16 = smov 0   ;;  %s1635_s0 = inlined_call_operand.vmem [shape: bf16[8,1024], index: 0, kind: input, shape index: {}]   ;;  %s1636_s1 = inlined_call_operand.vmem [shape: bf16[64,8], index: 1, kind: input, shape index: {}]   ;;  %s1637_s2 = inlined_call_operand.vmem [shape: f32[64,1], index: 2, kind: input, shape index: {}]   ;;  %s1638_s3 = inlined_call_operand.vmem [shape: f32[2,64,1], index: 3, kind: output, shape index: {0}]   ;;  %s1639_s4 = inlined_call_operand.vmem [shape: f32[2,64,64], index: 4, kind: output, shape index: {1}]  }
   0x1   :  { %s1188_s17 = smov 0  }
   0x2 LB: > { %s27_s18 = sadd.s32 1, %s1151_s16  ;;  %p971_p0 = scmp.ge.s32.totalorder %s1155_s17, 1  ;;  %s1155_s17 = sphi %s1188_s17, %s15_s17   ;;  %s1151_s16 = sphi %s1186_s16, %s1649_s16   ;;  %s1147_s15 = sphi %s1184_s15, %s1648_s15  }
   0x3   : > { %p29_p1 = scmp.ge.s32.totalorder %s27_s18, 2  ;;  %p182_p2 = scmp.lt.s32.totalorder %s1155_s17, 3 }
   0x5   : > { %s1651_s18 = smov (%p29_p1, %s27_s18), 0  ;;  %p183_p3 = pnand %p971_p0, %p182_p2 }
   0x6   : > { %s972_s19 = sshll.u32 (!%p183_p3), %s1147_s15, 2  ;;  %v1157_v0 = vmov (!%p183_p3), 0   ;;  %v265_v1 = vld [vmem:[%s1637_s2] sm:$0xff] (!%p183_p3)  ;;  %v267_v2 = vld [vmem:[%s1637_s2 + $0x10] sm:$0xff] (!%p183_p3)  ;;  %v266_v3 = vld [vmem:[%s1637_s2 + $0x8] sm:$0xff] (!%p183_p3)  ;;  %vm356_vm0 = vcmask (!%p183_p3), 1043456   ;;  %v581_v22 = vlaneseq (!%p183_p3) }
   0x7   : > { %186 = sbr.rel (%p183_p3) target bundleno = 527 (0x20f), region = 32  ;;  %p216_p4 = scmp.lt.s32.totalorder (!%p183_p3), %s972_s19, 7  ;;  %401 = vmatprep.mubr.bf16.mxu0 (!%p183_p3), %v1157_v0  ;;  %474 = vmatprep.mubr.bf16.mxu1 (!%p183_p3), %v1157_v0  ;;  %v268_v10 = vld [vmem:[%s1637_s2 + $0x18] sm:$0xff] (!%p183_p3)  ;;  %v1129_v13 = vld [vmem:[%s1636_s1] sm:$0xff] (!%p183_p3)   ;;  %vm343_vm1 = vcmask (!%p183_p3), 64512   ;;  %v270_v15 = vld [vmem:[%s1637_s2 + $0x28] sm:$0xff] (!%p183_p3) }
   0x8   : > { %1123 = vset.pattern.permute.xlu0 (!%p183_p3), %v1157_v0  ;;  %1124 = vset.pattern.permute.xlu1 (!%p183_p3), %v1157_v0  ;;  %v269_v14 = vld [vmem:[%s1637_s2 + $0x20] sm:$0xff] (!%p183_p3)  ;;  %v271_v16 = vld [vmem:[%s1637_s2 + $0x30] sm:$0xff] (!%p183_p3)  ;;  %v272_v17 = vld [vmem:[%s1637_s2 + $0x38] sm:$0xff] (!%p183_p3)  ;;  %p222_p5 = scmp.lt.s32.totalorder (!%p183_p3), %s1147_s15, 1  ;;  %vm237_vm2 = vcmask (!%p183_p3), 7168   ;;  %v1158_v21 = vmov (!%p183_p3), 0.0  }
   0x9   : > { %275 = vperm.xlu0 (!%p183_p3), %1123, %v265_v1   ;;  %285 = vperm.xlu1 (!%p183_p3), %1124, %v267_v2   ;;  %v1130_v18 = vld [vmem:[%s1636_s1 + $0x8] sm:$0xff] (!%p183_p3)   ;;  %v1131_v19 = vld [vmem:[%s1636_s1 + $0x10] sm:$0xff] (!%p183_p3)   ;;  %v1132_v20 = vld [vmem:[%s1636_s1 + $0x18] sm:$0xff] (!%p183_p3)   ;;  %s996_s5 = sshll.u32 (!%p183_p3), %s1147_s15, 9  ;;  %v582_v24 = vand.u32 (!%p183_p3), 127, %v581_v22  ;;  %vm246_vm11 = vcmask (!%p183_p3), 523264  }
   0xa   : > { %v586_v25 = vstv (!%p183_p3), %s996_s5 }
   0xb   : > { %v584_v26 = vadd.s32 (!%p183_p3), 256, %v582_v24  ;;  %v585_v27 = vadd.s32 (!%p183_p3), 384, %v582_v24  ;;  %v1289_v28 = vadd.s32 (!%p183_p3), %v586_v25, %v582_v24  ;;  %v583_v29 = vadd.s32 (!%p183_p3), 128, %v582_v24 }
   0xd   : > { %280 = vperm.xlu0 (!%p183_p3), %1123, %v266_v3   ;;  %290 = vperm.xlu1 (!%p183_p3), %1124, %v268_v10   ;;  %v1291_v35 = vadd.s32 (!%p183_p3), %v586_v25, %v584_v26  ;;  %v1293_v36 = vadd.s32 (!%p183_p3), %v586_v25, %v585_v27  ;;  %vm591_vm3 = vcmp.lt.s32.totalorder (!%p183_p3), %v1289_v28, 512  ;;  %v1296_v41 = vadd.s32 (!%p183_p3), %v586_v25, %v583_v29 }
   0xe   : > { %s1653_s19 = smov (!%p216_p4, %s972_s19), 7  ;;  %vm1337_vm9 = vmpackc.low %vm591_vm3, %vm591_vm3 }
   0xf   : > { %s973_s22 = sshll.u32 %s1653_s19, 2  ;;  %vm593_vm4 = vcmp.lt.s32.totalorder %v1291_v35, 512  ;;  %vm594_vm5 = vcmp.lt.s32.totalorder %v1293_v36, 512  ;;  %vm592_vm6 = vcmp.lt.s32.totalorder %v1296_v41, 512 }
  0x10   : > { %s219_s27 = scalar_lea.vmem %s1635_s0, %s973_s22  ;;  %vm1312_vm7 = vmpackc.low %vm592_vm6, %vm592_vm6 }
  0x11   : > { %v263_v4 = vld [vmem:[%s219_s27] sm:$0xff]  ;;  %v264_v5 = vld [vmem:[%s219_s27 + $0x8] sm:$0xff]  ;;  %295 = vperm.xlu0 %1123, %v269_v14   ;;  %300 = vperm.xlu1 %1124, %v270_v15   ;;  %s1254_s26 = scalar_select %p222_p5, %s1147_s15, 1  ;;  %vm1324_vm8 = vmpackc.low %vm594_vm5, %vm594_vm5 }
  0x12   : > { %v983_v6 = vcombine.high %v263_v4, %v263_v4  ;;  %v985_v7 = vcombine.high %v264_v5, %v264_v5  ;;  %v982_v8 = vcombine.low %v263_v4, %v263_v4  ;;  %v984_v9 = vcombine.low %v264_v5, %v264_v5  ;;  %vm1344_vm10 = vmpackc.low %vm593_vm4, %vm593_vm4 }
  0x13   : > { %s1095_s27 = sshll.u32 %s1254_s26, 6 }
  0x14   : > { %986 = vmatprep.subr.msk.bf16.mxu0 %vm356_vm0, %v983_v6  ;;  %991 = vmatprep.subr.msk.bf16.mxu1 %vm356_vm0, %v985_v7  ;;  %v358_v11 = vsel %vm356_vm0, %v982_v8, 0  ;;  %v364_v12 = vsel %vm356_vm0, %v984_v9, 0  ;;  %s1262_s30 = scalar_lea.vmem %s1638_s3, %s1095_s27  ;;  %s1552_s7 = scalar_lea.vmem %s1639_s4, %s1095_s27 }
  0x15   : > { %370 = vmatpush1.bf16.msra.mxu0 %v358_v11  ;;  %443 = vmatpush1.bf16.msra.mxu1 %v364_v12  ;;  %238 = vst.msk [vmem:[%s1262_s30] sm:$0xff] %vm237_vm2, %v1158_v21  ;;  %239 = vst.msk [vmem:[%s1262_s30 + $0x8] sm:$0xff] %vm237_vm2, %v1158_v21 }
  0x16   : > { %305 = vperm.xlu0 %1123, %v271_v16   ;;  %310 = vperm.xlu1 %1124, %v272_v17   ;;  %240 = vst.msk [vmem:[%s1262_s30 + $0x10] sm:$0xff] %vm237_vm2, %v1158_v21  ;;  %241 = vst.msk [vmem:[%s1262_s30 + $0x18] sm:$0xff] %vm237_vm2, %v1158_v21 }
  0x17   : > { %242 = vst.msk [vmem:[%s1262_s30 + $0x20] sm:$0xff] %vm237_vm2, %v1158_v21  ;;  %243 = vst.msk [vmem:[%s1262_s30 + $0x28] sm:$0xff] %vm237_vm2, %v1158_v21 }
  0x18   : > { %987 = vmatmul.mubr.msk.bf16.vlgmr.msra.gmra.mrb[0].mxu0 %vm343_vm1, %v1129_v13  ;;  %992 = vmatmul.mubr.msk.bf16.vlgmr.msra.gmra.mrb[0].mxu1 %vm343_vm1, %v1129_v13  ;;  %244 = vst.msk [vmem:[%s1262_s30 + $0x30] sm:$0xff] %vm237_vm2, %v1158_v21  ;;  %245 = vst.msk [vmem:[%s1262_s30 + $0x38] sm:$0xff] %vm237_vm2, %v1158_v21 }
  0x19   : > { %411 = vmatprep.mubr.bf16.mxu0 %v1157_v0  ;;  %484 = vmatprep.mubr.bf16.mxu1 %v1157_v0  ;;  %247 = vst.msk [vmem:[%s1552_s7] sm:$0xff] %vm246_vm11, %v1158_v21  ;;  %248 = vst.msk [vmem:[%s1552_s7 + $0x8] sm:$0xff] %vm246_vm11, %v1158_v21 }
  0x1a   : > { %249 = vst.msk [vmem:[%s1552_s7 + $0x10] sm:$0xff] %vm246_vm11, %v1158_v21  ;;  %250 = vst.msk [vmem:[%s1552_s7 + $0x18] sm:$0xff] %vm246_vm11, %v1158_v21 }
  0x1b   : > { %251 = vst.msk [vmem:[%s1552_s7 + $0x20] sm:$0xff] %vm246_vm11, %v1158_v21  ;;  %252 = vst.msk [vmem:[%s1552_s7 + $0x28] sm:$0xff] %vm246_vm11, %v1158_v21 }
  0x1c   : > { %253 = vst.msk [vmem:[%s1552_s7 + $0x30] sm:$0xff] %vm246_vm11, %v1158_v21  ;;  %254 = vst.msk [vmem:[%s1552_s7 + $0x38] sm:$0xff] %vm246_vm11, %v1158_v21  ;;  %v635_v35 = vld [vmem:[%s1262_s30] sm:$0xff] }
  0x1d   : > { %v637_v22 = vld [vmem:[%s1262_s30 + $0x10] sm:$0xff] }
  0x20   : > { %988 = vmatmul.mubr.msk.bf16.gmra.mrb[4].mxu0 %vm343_vm1, %v1130_v18  ;;  %993 = vmatmul.mubr.msk.bf16.gmra.mrb[4].mxu1 %vm343_vm1, %v1130_v18 }
  0x21   : > { %421 = vmatprep.mubr.bf16.mxu0 %v1157_v0  ;;  %494 = vmatprep.mubr.bf16.mxu1 %v1157_v0 }
  0x28   : > { %989 = vmatmul.mubr.msk.bf16.gmra.mrb[8].mxu0 %vm343_vm1, %v1131_v19  ;;  %994 = vmatmul.mubr.msk.bf16.gmra.mrb[8].mxu1 %vm343_vm1, %v1131_v19 }
  0x29   : > { %431 = vmatprep.mubr.bf16.mxu0 %v1157_v0  ;;  %504 = vmatprep.mubr.bf16.mxu1 %v1157_v0 }
  0x30   : > { %990 = vmatmul.mubr.msk.bf16.gmra.mrb[12].mxu0 %vm343_vm1, %v1132_v20  ;;  %995 = vmatmul.mubr.msk.bf16.gmra.mrb[12].mxu1 %vm343_vm1, %v1132_v20 }
  0x88   : > { %v276_v23 = vpop.permute.xlu0 %275  ;;  %v286_v31 = vpop.permute.xlu1 %285 }
  0x8c   : > { %v281_v30 = vpop.permute.xlu0 %280  ;;  %v291_v62 = vpop.permute.xlu1 %290 }
  0xeb   : > { %v403_v32 = vpop.f32.mrb[0].mxu0  ;;  %v476_v33 = vpop.f32.mrb[0].mxu1 }
  0xec   : > { %v404_v34 = vadd.f32 %v403_v32, %v276_v23  ;;  %v477_v37 = vadd.f32 %v476_v33, %v276_v23  ;;  %v405_v38 = vpop.f32.mrb[1].mxu0  ;;  %v478_v39 = vpop.f32.mrb[1].mxu1 }
  0xed   : > { %v406_v40 = vadd.f32 %v405_v38, %v276_v23  ;;  %v479_v42 = vadd.f32 %v478_v39, %v276_v23  ;;  %v407_v43 = vpop.f32.mrb[2].mxu0  ;;  %v480_v44 = vpop.f32.mrb[2].mxu1 }
  0xee   : > { %v515_v45 = vmul.f32 0.2, %v404_v34  ;;  %v517_v46 = vmul.f32 0.2, %v477_v37  ;;  %v408_v47 = vadd.f32 %v407_v43, %v281_v30  ;;  %v481_v48 = vadd.f32 %v480_v44, %v281_v30  ;;  %v409_v49 = vpop.f32.mrb[3].mxu0  ;;  %v482_v50 = vpop.f32.mrb[3].mxu1 }
  0xef   : > { %v516_v51 = vmul.f32 0.2, %v406_v40  ;;  %v518_v52 = vmul.f32 0.2, %v479_v42  ;;  %v410_v53 = vadd.f32 %v409_v49, %v281_v30  ;;  %v483_v54 = vadd.f32 %v482_v50, %v281_v30 }
  0xf0   : > { %v547_v55 = vmax.f32 %v404_v34, %v515_v45  ;;  %v549_v56 = vmax.f32 %v477_v37, %v517_v46  ;;  %v519_v57 = vmul.f32 0.2, %v408_v47  ;;  %v521_v58 = vmul.f32 0.2, %v481_v48  ;;  %v296_v45 = vpop.permute.xlu0 %295 }
  0xf1   : > { %v548_v59 = vmax.f32 %v406_v40, %v516_v51  ;;  %v520_v60 = vmul.f32 0.2, %v410_v53  ;;  %v522_v61 = vmul.f32 0.2, %v483_v54  ;;  %v1305_v2 = vmax.f32 %v479_v42, %v518_v52 }
  0xf2   : > { %v551_v63 = vmax.f32 %v408_v47, %v519_v57  ;;  %v1301_v0 = vmax.f32 %v481_v48, %v521_v58  ;;  %v603_v1 = vsel %vm591_vm3, %v547_v55, 0.0  ;;  %v605_v14 = vsel %vm593_vm4, %v549_v56, 0.0 }
  0xf3   : > { %v552_v3 = vmax.f32 %v410_v53, %v520_v60  ;;  %v1307_v4 = vmax.f32 %v483_v54, %v522_v61  ;;  %v413_v5 = vpop.f32.mrb[4].mxu0  ;;  %v486_v6 = vpop.f32.mrb[4].mxu1  ;;  %v604_v15 = vsel %vm592_vm6, %v548_v59, 0.0 }
  0xf4   : > { %v1316_v8 = vpack.c.bf16 %v551_v63, %v547_v55  ;;  %v1319_v9 = vpack.c.bf16 %v1301_v0, %v549_v56  ;;  %v414_v10 = vadd.f32 %v413_v5, %v286_v31  ;;  %v415_v11 = vpop.f32.mrb[5].mxu0  ;;  %v488_v12 = vpop.f32.mrb[5].mxu1  ;;  %v487_v18 = vadd.f32 %v486_v6, %v286_v31 }
  0xf5   : > { %v998_v16 = vpack.c.bf16 %v552_v3, %v548_v59  ;;  %v1046_v17 = vpack.c.bf16 %v1307_v4, %v1305_v2  ;;  %v417_v19 = vpop.f32.mrb[6].mxu0  ;;  %v490_v20 = vpop.f32.mrb[6].mxu1  ;;  %v416_v24 = vadd.f32 %v415_v11, %v286_v31  ;;  %v489_v25 = vadd.f32 %v488_v12, %v286_v31 }
  0xf6   : > { %v523_v23 = vmul.f32 0.2, %v414_v10  ;;  %v418_v26 = vadd.f32 %v417_v19, %v291_v62  ;;  %v419_v27 = vpop.f32.mrb[7].mxu0  ;;  %v492_v29 = vpop.f32.mrb[7].mxu1  ;;  %v525_v32 = vmul.f32 0.2, %v487_v18  ;;  %v491_v33 = vadd.f32 %v490_v20, %v291_v62 }
  0xf7   : > { %v420_v34 = vadd.f32 %v419_v27, %v291_v62  ;;  %v493_v37 = vadd.f32 %v492_v29, %v291_v62  ;;  %999 = vmatprep.subr.msk.bf16.mxu0 %vm1312_vm7, %v998_v16  ;;  %1023 = vmatprep.mubr.msk.bf16.mxu0 %vm1312_vm7, %v998_v16  ;;  %v524_v31 = vmul.f32 0.2, %v416_v24  ;;  %v526_v38 = vmul.f32 0.2, %v489_v25 }
  0xf8   : > { %v527_v39 = vmul.f32 0.2, %v418_v26  ;;  %1047 = vmatprep.subr.msk.bf16.mxu1 %vm1324_vm8, %v1046_v17  ;;  %1071 = vmatprep.mubr.msk.bf16.mxu1 %vm1324_vm8, %v1046_v17  ;;  %v555_v40 = vmax.f32 %v414_v10, %v523_v23  ;;  %v529_v42 = vmul.f32 0.2, %v491_v33  ;;  %v1362_v46 = vmax.f32 %v487_v18, %v525_v32 }
  0xf9   : > { %v528_v43 = vmul.f32 0.2, %v420_v34  ;;  %v530_v44 = vmul.f32 0.2, %v493_v37  ;;  %1002 = vmatpush1.bf16.xpose.msk.msra.mxu0 %vm1337_vm9, %v1316_v8  ;;  %1050 = vmatpush1.bf16.xpose.msk.msra.mxu1 %vm1344_vm10, %v1319_v9  ;;  %v556_v47 = vmax.f32 %v416_v24, %v524_v31  ;;  %v1364_v48 = vmax.f32 %v489_v25, %v526_v38 }
  0xfa   : > { %v559_v49 = vmax.f32 %v418_v26, %v527_v39  ;;  %v1366_v50 = vmax.f32 %v491_v33, %v529_v42  ;;  %v643_v53 = vadd.f32 %v604_v15, %v603_v1  ;;  %v607_v56 = vsel %vm591_vm3, %v551_v63, 0.0 }
  0xfb   : > { %v560_v51 = vmax.f32 %v420_v34, %v528_v43  ;;  %v1368_v52 = vmax.f32 %v493_v37, %v530_v44  ;;  %v423_v54 = vpop.f32.mrb[8].mxu0  ;;  %v496_v55 = vpop.f32.mrb[8].mxu1  ;;  %v608_v57 = vsel %vm592_vm6, %v552_v3, 0.0  ;;  %v606_v63 = vsel %vm594_vm5, %v1305_v2, 0.0 }
  0xfc   : > { %v1374_v58 = vpack.c.bf16 %v559_v49, %v555_v40  ;;  %v424_v59 = vadd.f32 %v423_v54, %v296_v45  ;;  %v425_v60 = vpop.f32.mrb[9].mxu0  ;;  %v498_v61 = vpop.f32.mrb[9].mxu1  ;;  %v1378_v62 = vpack.c.bf16 %v1366_v50, %v1362_v46  ;;  %v611_v10 = vsel %vm591_vm3, %v555_v40, 0.0 }
  0xfd   : > { %v1380_v5 = vpack.c.bf16 %v560_v51, %v556_v47  ;;  %v1384_v1 = vpack.c.bf16 %v1368_v52, %v1364_v48  ;;  %v427_v3 = vpop.f32.mrb[10].mxu0  ;;  %v500_v6 = vpop.f32.mrb[10].mxu1  ;;  %v644_v11 = vadd.f32 %v643_v53, %v605_v14  ;;  %v497_v12 = vadd.f32 %v496_v55, %v296_v45 }
  0xfe   : > { %v426_v15 = vadd.f32 %v425_v60, %v296_v45  ;;  %v429_v16 = vpop.f32.mrb[11].mxu0  ;;  %v502_v17 = vpop.f32.mrb[11].mxu1  ;;  %v612_v18 = vsel %vm592_vm6, %v556_v47, 0.0  ;;  %v531_v19 = vmul.f32 0.2, %v424_v59  ;;  %v499_v20 = vadd.f32 %v498_v61, %v296_v45 }
  0xff   : > { %v648_v23 = vadd.f32 %v608_v57, %v607_v56  ;;  %1005 = vmatprep.subr.msk.bf16.mxu0 %vm1312_vm7, %v1380_v5  ;;  %1053 = vmatprep.subr.msk.bf16.mxu1 %vm1324_vm8, %v1384_v1  ;;  %v301_v2 = vpop.permute.xlu1 %300  ;;  %v645_v14 = vadd.f32 %v644_v11, %v606_v63  ;;  %v533_v24 = vmul.f32 0.2, %v497_v12  ;;  %v609_v26 = vsel %vm593_vm4, %v1301_v0, 0.0  ;;  %v306_v34 = vpop.permute.xlu0 %305 }
 0x100   : > { %v532_v25 = vmul.f32 0.2, %v426_v15  ;;  %v1404_v27 = vsel %vm591_vm3, %v559_v49, 0.0  ;;  %v428_v32 = vadd.f32 %v427_v3, %v301_v2  ;;  %v501_v33 = vadd.f32 %v500_v6, %v301_v2 }
 0x101   : > { %v649_v29 = vadd.f32 %v648_v23, %v609_v26  ;;  %1008 = vmatpush1.bf16.xpose.msk.msra.mxu0 %vm1337_vm9, %v1374_v58  ;;  %1056 = vmatpush1.bf16.xpose.msk.msra.mxu1 %vm1344_vm10, %v1378_v62  ;;  %v1414_v37 = vsel %vm592_vm6, %v560_v51, 0.0  ;;  %v534_v0 = vmul.f32 0.2, %v499_v20  ;;  %v610_v31 = vsel %vm594_vm5, %v1307_v4, 0.0 }
 0x102   : > { %646 = vadd.xlane.f32.xlu0 %v645_v14  ;;  %v430_v38 = vadd.f32 %v429_v16, %v301_v2  ;;  %v563_v39 = vmax.f32 %v424_v59, %v531_v19  ;;  %v535_v42 = vmul.f32 0.2, %v428_v32  ;;  %v537_v43 = vmul.f32 0.2, %v501_v33 }
 0x103   : > { %v650_v40 = vadd.f32 %v649_v29, %v610_v31  ;;  %v433_v44 = vpop.f32.mrb[12].mxu0  ;;  %v506_v45 = vpop.f32.mrb[12].mxu1  ;;  %v1419_v47 = vmax.f32 %v497_v12, %v533_v24  ;;  %v564_v49 = vmax.f32 %v426_v15, %v532_v25  ;;  %v503_v54 = vadd.f32 %v502_v17, %v301_v2 }
 0x104   : > { %v536_v53 = vmul.f32 0.2, %v430_v38  ;;  %v435_v51 = vpop.f32.mrb[13].mxu0  ;;  %v508_v55 = vpop.f32.mrb[13].mxu1  ;;  %v567_v56 = vmax.f32 %v428_v32, %v535_v42  ;;  %v1421_v57 = vmax.f32 %v501_v33, %v537_v43  ;;  %v613_v4 = vsel %vm593_vm4, %v1362_v46, 0.0 }
 0x105   : > { %651 = vadd.xlane.f32.xlu1 %v650_v40  ;;  %v653_v59 = vadd.f32 %v612_v18, %v611_v10  ;;  %v437_v60 = vpop.f32.mrb[14].mxu0  ;;  %v510_v61 = vpop.f32.mrb[14].mxu1  ;;  %v538_v3 = vmul.f32 0.2, %v503_v54  ;;  %v434_v6 = vadd.f32 %v433_v44, %v306_v34  ;;  %v507_v11 = vadd.f32 %v506_v45, %v306_v34 }
 0x106   : > { %v568_v63 = vmax.f32 %v430_v38, %v536_v53  ;;  %v439_v12 = vpop.f32.mrb[15].mxu0  ;;  %v512_v15 = vpop.f32.mrb[15].mxu1  ;;  %v1426_v16 = vmax.f32 %v499_v20, %v534_v0  ;;  %v1428_v17 = vpack.c.bf16 %v567_v56, %v563_v39  ;;  %v1432_v19 = vpack.c.bf16 %v1421_v57, %v1419_v47 }
 0x107   : > { %v654_v23 = vadd.f32 %v653_v59, %v613_v4  ;;  %v1436_v46 = vmax.f32 %v503_v54, %v538_v3  ;;  %v614_v10 = vsel %vm594_vm5, %v1364_v48, 0.0  ;;  %v539_v18 = vmul.f32 0.2, %v434_v6  ;;  %v311_v14 = vpop.permute.xlu1 %310 }
 0x108   : > { %v1434_v2 = vpack.c.bf16 %v568_v63, %v564_v49  ;;  %v619_v20 = vsel %vm591_vm3, %v563_v39, 0.0  ;;  %v436_v25 = vadd.f32 %v435_v51, %v306_v34  ;;  %v509_v26 = vadd.f32 %v508_v55, %v306_v34 }
 0x109   : > { %v655_v24 = vadd.f32 %v654_v23, %v614_v10  ;;  %v1445_v29 = vpack.c.bf16 %v1436_v46, %v1426_v16  ;;  %v541_v32 = vmul.f32 0.2, %v507_v11  ;;  %v438_v33 = vadd.f32 %v437_v60, %v311_v14 }
 0x10a   : > { %v511_v0 = vadd.f32 %v510_v61, %v311_v14  ;;  %1011 = vmatprep.subr.msk.bf16.mxu0 %vm1312_vm7, %v1434_v2  ;;  %v571_v48 = vmax.f32 %v434_v6, %v539_v18  ;;  %v540_v31 = vmul.f32 0.2, %v436_v25  ;;  %v542_v38 = vmul.f32 0.2, %v509_v26 }
 0x10b   : > { %656 = vadd.xlane.f32.xlu0 %v655_v24  ;;  %v440_v40 = vadd.f32 %v439_v12, %v311_v14  ;;  %1014 = vmatpush1.bf16.xpose.msk.msra.mxu0 %vm1337_vm9, %v1428_v17  ;;  %v620_v34 = vsel %vm592_vm6, %v564_v49, 0.0  ;;  %v543_v39 = vmul.f32 0.2, %v438_v33  ;;  %v513_v43 = vadd.f32 %v512_v15, %v311_v14 }
 0x10c   : > { %v545_v42 = vmul.f32 0.2, %v511_v0  ;;  %1059 = vmatprep.subr.msk.bf16.mxu1 %vm1324_vm8, %v1445_v29  ;;  %v623_v44 = vsel %vm591_vm3, %v567_v56, 0.0  ;;  %v624_v45 = vsel %vm592_vm6, %v568_v63, 0.0  ;;  %v572_v53 = vmax.f32 %v436_v25, %v540_v31 }
 0x10d   : > { %v544_v54 = vmul.f32 0.2, %v440_v40  ;;  %1062 = vmatpush1.bf16.xpose.msk.msra.mxu1 %vm1344_vm10, %v1432_v19  ;;  %v573_v49 = vmax.f32 %v507_v11, %v541_v32  ;;  %v575_v51 = vmax.f32 %v438_v33, %v543_v39  ;;  %v546_v4 = vmul.f32 0.2, %v513_v43 }
 0x10e   : > { %v577_v55 = vmax.f32 %v511_v0, %v545_v42  ;;  %v627_v59 = vsel %vm591_vm3, %v571_v48, 0.0  ;;  %v574_v60 = vmax.f32 %v509_v26, %v542_v38  ;;  %v658_v56 = vadd.f32 %v1414_v37, %v1404_v27  ;;  %v641_v42 = vld [vmem:[%s1262_s30 + $0x30] sm:$0xff] }
 0x10f   : > { %v576_v61 = vmax.f32 %v440_v40, %v544_v54  ;;  %v1019_v3 = vpack.c.bf16 %v575_v51, %v571_v48  ;;  %v578_v6 = vmax.f32 %v513_v43, %v546_v4  ;;  %v617_v12 = vsel %vm593_vm4, %v1366_v50, 0.0  ;;  %v642_v43 = vld [vmem:[%s1262_s30 + $0x38] sm:$0xff] }
 0x110   : > { %v1067_v63 = vpack.c.bf16 %v577_v55, %v573_v49  ;;  %v628_v11 = vsel %vm592_vm6, %v572_v53, 0.0  ;;  %v618_v23 = vsel %vm594_vm5, %v1368_v52, 0.0  ;;  %v659_v10 = vadd.f32 %v658_v56, %v617_v12  ;;  %v717_v56 = vld [vmem:[%s1552_s7 + $0x8] sm:$0xff] }
 0x111   : > { %v1016_v15 = vpack.c.bf16 %v576_v61, %v572_v53  ;;  %v631_v18 = vsel %vm591_vm3, %v575_v51, 0.0  ;;  %v632_v27 = vsel %vm592_vm6, %v576_v61, 0.0  ;;  %v1064_v37 = vpack.c.bf16 %v578_v6, %v574_v60  ;;  %v716_v51 = vld [vmem:[%s1552_s7] sm:$0xff] }
 0x112   : > { %v663_v14 = vadd.f32 %v620_v34, %v619_v20  ;;  %v660_v24 = vadd.f32 %v659_v10, %v618_v23  ;;  %v621_v50 = vsel %vm593_vm4, %v1419_v47, 0.0  ;;  %v668_v25 = vadd.f32 %v624_v45, %v623_v44  ;;  %v718_v10 = vld [vmem:[%s1552_s7 + $0x10] sm:$0xff] }
 0x113   : > { %1017 = vmatprep.subr.msk.bf16.mxu0 %vm1312_vm7, %v1016_v15  ;;  %v625_v28 = vsel %vm593_vm4, %v1421_v57, 0.0  ;;  %1065 = vmatprep.subr.msk.bf16.mxu1 %vm1324_vm8, %v1064_v37  ;;  %v673_v41 = vadd.f32 %v628_v11, %v627_v59  ;;  %v622_v52 = vsel %vm594_vm5, %v1426_v16, 0.0  ;;  %v629_v20 = vsel %vm593_vm4, %v573_v49, 0.0 }
 0x114   : > { %v664_v26 = vadd.f32 %v663_v14, %v621_v50  ;;  %1020 = vmatpush1.bf16.xpose.msk.msra.mxu0 %vm1337_vm9, %v1019_v3  ;;  %661 = vadd.xlane.f32.xlu0 %v660_v24  ;;  %v669_v47 = vadd.f32 %v668_v25, %v625_v28  ;;  %v678_v57 = vadd.f32 %v632_v27, %v631_v18  ;;  %v626_v33 = vsel %vm594_vm5, %v1436_v46, 0.0  ;;  %v719_v50 = vld [vmem:[%s1552_s7 + $0x18] sm:$0xff] }
 0x115   : > { %1068 = vmatpush1.bf16.xpose.msk.msra.mxu1 %vm1344_vm10, %v1067_v63  ;;  %v674_v0 = vadd.f32 %v673_v41, %v629_v20  ;;  %v633_v48 = vsel %vm593_vm4, %v577_v55, 0.0  ;;  %v630_v16 = vsel %vm594_vm5, %v574_v60, 0.0  ;;  %v634_v34 = vsel %vm594_vm5, %v578_v6, 0.0 }
 0x116   : > { %v665_v32 = vadd.f32 %v664_v26, %v622_v52  ;;  %v670_v31 = vadd.f32 %v669_v47, %v626_v33  ;;  %v679_v38 = vadd.f32 %v678_v57, %v633_v48  ;;  %v720_v57 = vld [vmem:[%s1552_s7 + $0x20] sm:$0xff] }
 0x117   : > { %v675_v40 = vadd.f32 %v674_v0, %v630_v16  ;;  %v721_v16 = vld [vmem:[%s1552_s7 + $0x28] sm:$0xff] }
 0x118   : > { %666 = vadd.xlane.f32.xlu1 %v665_v32  ;;  %671 = vadd.xlane.f32.xlu0 %v670_v31  ;;  %v680_v39 = vadd.f32 %v679_v38, %v634_v34 }
 0x11b   : > { %1026 = vmatmul.mubr.msk.bf16.vlgmr.msra.gmra.mrb[16].mxu0 %vm1337_vm9, %v1316_v8  ;;  %v636_v8 = vld [vmem:[%s1262_s30 + $0x8] sm:$0xff] }
 0x11c   : > { %676 = vadd.xlane.f32.xlu1 %v675_v40  ;;  %1074 = vmatmul.mubr.msk.bf16.vlgmr.msra.gmra.mrb[16].mxu1 %vm1344_vm10, %v1319_v9 }
 0x11d   : > { %681 = vadd.xlane.f32.xlu0 %v680_v39  ;;  %1029 = vmatprep.mubr.msk.bf16.mxu0 %vm1312_vm7, %v1380_v5 }
 0x11e   : > { %1077 = vmatprep.mubr.msk.bf16.mxu1 %vm1324_vm8, %v1384_v1  ;;  %v639_v1 = vld [vmem:[%s1262_s30 + $0x20] sm:$0xff] }
 0x123   : > { %1032 = vmatmul.mubr.msk.bf16.gmra.mrb[20].mxu0 %vm1337_vm9, %v1374_v58  ;;  %v638_v58 = vld [vmem:[%s1262_s30 + $0x18] sm:$0xff] }
 0x124   : > { %1080 = vmatmul.mubr.msk.bf16.gmra.mrb[20].mxu1 %vm1344_vm10, %v1378_v62  ;;  %1035 = vmatprep.mubr.msk.bf16.mxu0 %vm1312_vm7, %v1434_v2 }
 0x125   : > { %1083 = vmatprep.mubr.msk.bf16.mxu1 %vm1324_vm8, %v1445_v29 }
 0x12b   : > { %1038 = vmatmul.mubr.msk.bf16.gmra.mrb[24].mxu0 %vm1337_vm9, %v1428_v17  ;;  %v640_v17 = vld [vmem:[%s1262_s30 + $0x28] sm:$0xff] }
 0x12c   : > { %1086 = vmatmul.mubr.msk.bf16.gmra.mrb[24].mxu1 %vm1344_vm10, %v1432_v19  ;;  %1041 = vmatprep.mubr.msk.bf16.mxu0 %vm1312_vm7, %v1016_v15 }
 0x12d   : > { %1089 = vmatprep.mubr.msk.bf16.mxu1 %vm1324_vm8, %v1064_v37 }
 0x133   : > { %1044 = vmatmul.mubr.msk.bf16.gmra.mrb[28].mxu0 %vm1337_vm9, %v1019_v3 }
 0x134   : > { %1092 = vmatmul.mubr.msk.bf16.gmra.mrb[28].mxu1 %vm1344_vm10, %v1067_v63 }
 0x18f   : > { %v647_v36 = vpop.xlane.xlu0 %646 }
 0x190   : > { %v683_v7 = vadd.f32 %v647_v36, %v635_v35 }
 0x192   : > { %692 = vst.msk [vmem:[%s1262_s30] sm:$0xff] %vm237_vm2, %v683_v7  ;;  %v652_v9 = vpop.xlane.xlu1 %651 }
 0x193   : > { %v684_v13 = vadd.f32 %v652_v9, %v636_v8  ;;  %v722_v8 = vld [vmem:[%s1552_s7 + $0x30] sm:$0xff] }
 0x195   : > { %693 = vst.msk [vmem:[%s1262_s30 + $0x8] sm:$0xff] %vm237_vm2, %v684_v13 }
 0x198   : > { %v657_v30 = vpop.xlane.xlu0 %656 }
 0x199   : > { %v685_v21 = vadd.f32 %v657_v30, %v637_v22 }
 0x19b   : > { %694 = vst.msk [vmem:[%s1262_s30 + $0x10] sm:$0xff] %vm237_vm2, %v685_v21 }
 0x1a1   : > { %v662_v62 = vpop.xlane.xlu0 %661 }
 0x1a2   : > { %v686_v5 = vadd.f32 %v662_v62, %v638_v58  ;;  %v723_v58 = vld [vmem:[%s1552_s7 + $0x38] sm:$0xff] }
 0x1a4   : > { %695 = vst.msk [vmem:[%s1262_s30 + $0x18] sm:$0xff] %vm237_vm2, %v686_v5 }
 0x1a5   : > { %v667_v19 = vpop.xlane.xlu1 %666  ;;  %v672_v46 = vpop.xlane.xlu0 %671 }
 0x1a6   : > { %v687_v2 = vadd.f32 %v667_v19, %v639_v1  ;;  %v688_v29 = vadd.f32 %v672_v46, %v640_v17 }
 0x1a8   : > { %696 = vst.msk [vmem:[%s1262_s30 + $0x20] sm:$0xff] %vm237_vm2, %v687_v2  ;;  %697 = vst.msk [vmem:[%s1262_s30 + $0x28] sm:$0xff] %vm237_vm2, %v688_v29 }
 0x1a9   : > { %v677_v44 = vpop.xlane.xlu1 %676 }
 0x1aa   : > { %v689_v45 = vadd.f32 %v677_v44, %v641_v42  ;;  %v682_v53 = vpop.xlane.xlu0 %681 }
 0x1ab   : > { %v690_v54 = vadd.f32 %v682_v53, %v642_v43 }
 0x1ac   : > { %698 = vst.msk [vmem:[%s1262_s30 + $0x30] sm:$0xff] %vm237_vm2, %v689_v45 }
 0x1ad   : > { %699 = vst.msk [vmem:[%s1262_s30 + $0x38] sm:$0xff] %vm237_vm2, %v690_v54 }
 0x1ee   : > { %v758_v49 = vpop.f32.mrb[16].mxu0 }
 0x1ef   : > { %v823_v55 = vpop.f32.mrb[16].mxu1  ;;  %v760_v4 = vpop.f32.mrb[17].mxu0 }
 0x1f0   : > { %v824_v59 = vadd.f32 %v823_v55, %v758_v49  ;;  %v825_v60 = vpop.f32.mrb[17].mxu1  ;;  %v761_v61 = vpop.f32.mrb[18].mxu0 }
 0x1f1   : > { %v826_v3 = vpop.f32.mrb[18].mxu1  ;;  %v763_v63 = vpop.f32.mrb[19].mxu0 }
 0x1f2   : > { %v854_v6 = vadd.f32 %v824_v59, %v716_v51  ;;  %v827_v12 = vadd.f32 %v826_v3, %v761_v61  ;;  %v828_v11 = vpop.f32.mrb[19].mxu1 }
 0x1f4   : > { %863 = vst.msk [vmem:[%s1552_s7] sm:$0xff] %vm246_vm11, %v854_v6  ;;  %v855_v15 = vadd.f32 %v827_v12, %v717_v56 }
 0x1f6   : > { %864 = vst.msk [vmem:[%s1552_s7 + $0x8] sm:$0xff] %vm246_vm11, %v855_v15  ;;  %v766_v23 = vpop.f32.mrb[20].mxu0 }
 0x1f7   : > { %v831_v18 = vpop.f32.mrb[20].mxu1  ;;  %v768_v27 = vpop.f32.mrb[21].mxu0 }
 0x1f8   : > { %v832_v37 = vadd.f32 %v831_v18, %v766_v23  ;;  %v833_v14 = vpop.f32.mrb[21].mxu1  ;;  %v769_v24 = vpop.f32.mrb[22].mxu0 }
 0x1f9   : > { %v834_v25 = vpop.f32.mrb[22].mxu1  ;;  %v771_v26 = vpop.f32.mrb[23].mxu0 }
 0x1fa   : > { %v856_v28 = vadd.f32 %v832_v37, %v718_v10  ;;  %v835_v41 = vadd.f32 %v834_v25, %v769_v24  ;;  %v836_v52 = vpop.f32.mrb[23].mxu1 }
 0x1fc   : > { %865 = vst.msk [vmem:[%s1552_s7 + $0x10] sm:$0xff] %vm246_vm11, %v856_v28  ;;  %v857_v47 = vadd.f32 %v835_v41, %v719_v50 }
 0x1fe   : > { %866 = vst.msk [vmem:[%s1552_s7 + $0x18] sm:$0xff] %vm246_vm11, %v857_v47  ;;  %v774_v20 = vpop.f32.mrb[24].mxu0 }
 0x1ff   : > { %v839_v32 = vpop.f32.mrb[24].mxu1  ;;  %v776_v33 = vpop.f32.mrb[25].mxu0 }
 0x200   : > { %v840_v0 = vadd.f32 %v839_v32, %v774_v20  ;;  %v841_v48 = vpop.f32.mrb[25].mxu1  ;;  %v777_v31 = vpop.f32.mrb[26].mxu0 }
 0x201   : > { %v842_v38 = vpop.f32.mrb[26].mxu1  ;;  %v779_v40 = vpop.f32.mrb[27].mxu0 }
 0x202   : > { %v858_v34 = vadd.f32 %v840_v0, %v720_v57  ;;  %v843_v39 = vadd.f32 %v842_v38, %v777_v31  ;;  %v844_v35 = vpop.f32.mrb[27].mxu1 }
 0x204   : > { %867 = vst.msk [vmem:[%s1552_s7 + $0x20] sm:$0xff] %vm246_vm11, %v858_v34  ;;  %v859_v36 = vadd.f32 %v843_v39, %v721_v16 }
 0x206   : > { %868 = vst.msk [vmem:[%s1552_s7 + $0x28] sm:$0xff] %vm246_vm11, %v859_v36  ;;  %v782_v7 = vpop.f32.mrb[28].mxu0 }
 0x207   : > { %v847_v9 = vpop.f32.mrb[28].mxu1  ;;  %v784_v13 = vpop.f32.mrb[29].mxu0 }
 0x208   : > { %v848_v22 = vadd.f32 %v847_v9, %v782_v7  ;;  %v849_v30 = vpop.f32.mrb[29].mxu1  ;;  %v785_v21 = vpop.f32.mrb[30].mxu0 }
 0x209   : > { %v850_v62 = vpop.f32.mrb[30].mxu1  ;;  %v787_v5 = vpop.f32.mrb[31].mxu0 }
 0x20a   : > { %v860_v1 = vadd.f32 %v848_v22, %v722_v8  ;;  %v851_v17 = vadd.f32 %v850_v62, %v785_v21  ;;  %v852_v19 = vpop.f32.mrb[31].mxu1 }
 0x20c   : > { %869 = vst.msk [vmem:[%s1552_s7 + $0x30] sm:$0xff] %vm246_vm11, %v860_v1  ;;  %v861_v2 = vadd.f32 %v851_v17, %v723_v58 }
 0x20e   : > { %870 = vst.msk [vmem:[%s1552_s7 + $0x38] sm:$0xff] %vm246_vm11, %v861_v2 }
 0x20f PF: > { %s15_s17 = sadd.s32 1, %s1155_s17   ;;  %s1648_s15 = smov %s1151_s16 }
 0x210   : > { %p12_p6 = scmp.ge.s32.totalorder %s15_s17, 4   ;;  %s1649_s16 = smov %s1651_s18 }
 0x212   :  { %14 = sbr.rel (!%p12_p6) target bundleno = 2 (0x2), region = 78 }

// kernel: pixel_discriminator.3
= control target key start
LH: loop header
LB: loop body
LE: loop exit
PB: predicated region body
PF: predicated region fallthrough
CT: control target
= control target key end

     0   :  { %s1497_s21 = smov 0   ;;  %s1681_s0 = inlined_call_operand.vmem [shape: bf16[8,1024], index: 0, kind: input, shape index: {}]   ;;  %s1682_s1 = inlined_call_operand.vmem [shape: bf16[64,8], index: 1, kind: input, shape index: {}]   ;;  %s1683_s2 = inlined_call_operand.vmem [shape: f32[64,1], index: 2, kind: input, shape index: {}]   ;;  %s1684_s3 = inlined_call_operand.vmem [shape: bf16[128,64], index: 3, kind: input, shape index: {}]   ;;  %s1685_s4 = inlined_call_operand.vmem [shape: f32[128,1], index: 4, kind: input, shape index: {}]   ;;  %s1686_s5 = inlined_call_operand.vmem [shape: bf16[1,128], index: 5, kind: input, shape index: {}]   ;;  %s1687_s6 = inlined_call_operand.vmem [shape: f32[1,1024], index: 6, kind: output, shape index: {}]  }
   0x1 LB: > { %s1352_s22 = sadd.s32 4294967295, %s1458_s21   ;;  %p1356_p0 = scmp.ge.s32.totalorder %s1458_s21, 1  ;;  %s1458_s21 = sphi %s1497_s21, %s16_s21  }
   0x2   : > { %p213_p1 = scmp.lt.s32.totalorder %s1458_s21, 3 }
   0x4   : > { %p214_p2 = pnand %p1356_p0, %p213_p1 }
   0x5   : > { %s1357_s23 = sshll.u32 (!%p214_p2), %s1352_s22, 2  ;;  %v1460_v0 = vmov (!%p214_p2), 0   ;;  %v264_v1 = vld [vmem:[%s1683_s2] sm:$0xff] (!%p214_p2)  ;;  %v266_v2 = vld [vmem:[%s1683_s2 + $0x10] sm:$0xff] (!%p214_p2)  ;;  %v265_v3 = vld [vmem:[%s1683_s2 + $0x8] sm:$0xff] (!%p214_p2)  ;;  %vm355_vm0 = vcmask (!%p214_p2), 1043456  }
   0x6   : > { %217 = sbr.rel (%p214_p2) target bundleno = 811 (0x32b), region = 44  ;;  %p243_p3 = scmp.lt.s32.totalorder (!%p214_p2), %s1357_s23, 7  ;;  %400 = vmatprep.mubr.bf16.mxu0 (!%p214_p2), %v1460_v0  ;;  %473 = vmatprep.mubr.bf16.mxu1 (!%p214_p2), %v1460_v0  ;;  %v267_v10 = vld [vmem:[%s1683_s2 + $0x18] sm:$0xff] (!%p214_p2)  ;;  %v1424_v13 = vld [vmem:[%s1682_s1] sm:$0xff] (!%p214_p2)   ;;  %vm342_vm1 = vcmask (!%p214_p2), 64512   ;;  %v270_v15 = vld [vmem:[%s1683_s2 + $0x30] sm:$0xff] (!%p214_p2) }
   0x7   : > { %1418 = vset.pattern.permute.xlu0 (!%p214_p2), %v1460_v0  ;;  %1419 = vset.pattern.permute.xlu1 (!%p214_p2), %v1460_v0  ;;  %v268_v14 = vld [vmem:[%s1683_s2 + $0x20] sm:$0xff] (!%p214_p2)  ;;  %v269_v16 = vld [vmem:[%s1683_s2 + $0x28] sm:$0xff] (!%p214_p2)  ;;  %v271_v17 = vld [vmem:[%s1683_s2 + $0x38] sm:$0xff] (!%p214_p2)  ;;  %vm746_vm2 = vcmask (!%p214_p2), 523264  }
   0x8   : > { %274 = vperm.xlu0 (!%p214_p2), %1418, %v264_v1   ;;  %284 = vperm.xlu1 (!%p214_p2), %1419, %v266_v2   ;;  %v1425_v18 = vld [vmem:[%s1682_s1 + $0x8] sm:$0xff] (!%p214_p2)   ;;  %v610_v19 = vld [vmem:[%s1685_s4] sm:$0xff] (!%p214_p2)  ;;  %v612_v21 = vld [vmem:[%s1685_s4 + $0x10] sm:$0xff] (!%p214_p2) }
   0x9   : > { %v611_v20 = vld [vmem:[%s1685_s4 + $0x8] sm:$0xff] (!%p214_p2)  ;;  %v613_v22 = vld [vmem:[%s1685_s4 + $0x18] sm:$0xff] (!%p214_p2)  ;;  %v1426_v23 = vld [vmem:[%s1682_s1 + $0x10] sm:$0xff] (!%p214_p2)  }
   0xa   : > { %v614_v24 = vld [vmem:[%s1685_s4 + $0x20] sm:$0xff] (!%p214_p2)  ;;  %v615_v25 = vld [vmem:[%s1685_s4 + $0x28] sm:$0xff] (!%p214_p2)  ;;  %v616_v26 = vld [vmem:[%s1685_s4 + $0x30] sm:$0xff] (!%p214_p2) }
   0xb   : > { %v617_v27 = vld [vmem:[%s1685_s4 + $0x38] sm:$0xff] (!%p214_p2)  ;;  %v618_v29 = vld [vmem:[%s1685_s4 + $0x40] sm:$0xff] (!%p214_p2)  ;;  %v619_v30 = vld [vmem:[%s1685_s4 + $0x48] sm:$0xff] (!%p214_p2) }
   0xc   : > { %279 = vperm.xlu0 (!%p214_p2), %1418, %v265_v3   ;;  %289 = vperm.xlu1 (!%p214_p2), %1419, %v267_v10   ;;  %v1427_v28 = vld [vmem:[%s1682_s1 + $0x18] sm:$0xff] (!%p214_p2)   ;;  %v620_v31 = vld [vmem:[%s1685_s4 + $0x50] sm:$0xff] (!%p214_p2)  ;;  %v622_v33 = vld [vmem:[%s1685_s4 + $0x60] sm:$0xff] (!%p214_p2) }
   0xd   : > { %s1689_s23 = smov (!%p243_p3, %s1357_s23), 7  ;;  %v621_v32 = vld [vmem:[%s1685_s4 + $0x58] sm:$0xff]  ;;  %v623_v34 = vld [vmem:[%s1685_s4 + $0x68] sm:$0xff]  ;;  %v624_v35 = vld [vmem:[%s1685_s4 + $0x70] sm:$0xff] }
   0xe   : > { %s1358_s26 = sshll.u32 %s1689_s23, 2  ;;  %v625_v36 = vld [vmem:[%s1685_s4 + $0x78] sm:$0xff]  ;;  %s251_s14 = scalar_lea.vmem %s1687_s6, %s1689_s23 }
   0xf   : > { %s246_s7 = scalar_lea.vmem %s1681_s0, %s1358_s26 }
  0x10   : > { %v262_v4 = vld [vmem:[%s246_s7] sm:$0xff]  ;;  %v263_v5 = vld [vmem:[%s246_s7 + $0x8] sm:$0xff]  ;;  %294 = vperm.xlu0 %1418, %v268_v14   ;;  %299 = vperm.xlu1 %1419, %v269_v16  }
  0x11   : > { %v1365_v6 = vcombine.high %v262_v4, %v262_v4  ;;  %v1367_v7 = vcombine.high %v263_v5, %v263_v5  ;;  %v1364_v8 = vcombine.low %v262_v4, %v262_v4  ;;  %v1366_v9 = vcombine.low %v263_v5, %v263_v5 }
  0x13   : > { %1368 = vmatprep.subr.msk.bf16.mxu0 %vm355_vm0, %v1365_v6  ;;  %1373 = vmatprep.subr.msk.bf16.mxu1 %vm355_vm0, %v1367_v7  ;;  %v357_v11 = vsel %vm355_vm0, %v1364_v8, 0  ;;  %v363_v12 = vsel %vm355_vm0, %v1366_v9, 0 }
  0x14   : > { %369 = vmatpush1.bf16.msra.mxu0 %v357_v11  ;;  %442 = vmatpush1.bf16.msra.mxu1 %v363_v12 }
  0x15   : > { %304 = vperm.xlu0 %1418, %v270_v15   ;;  %309 = vperm.xlu1 %1419, %v271_v17  }
  0x17   : > { %1369 = vmatmul.mubr.msk.bf16.vlgmr.msra.gmra.mrb[0].mxu0 %vm342_vm1, %v1424_v13  ;;  %1374 = vmatmul.mubr.msk.bf16.vlgmr.msra.gmra.mrb[0].mxu1 %vm342_vm1, %v1424_v13 }
  0x18   : > { %410 = vmatprep.mubr.bf16.mxu0 %v1460_v0  ;;  %483 = vmatprep.mubr.bf16.mxu1 %v1460_v0 }
  0x19   : > { %628 = vperm.xlu0 %1418, %v610_v19   ;;  %633 = vperm.xlu1 %1419, %v611_v20  }
  0x1d   : > { %638 = vperm.xlu0 %1418, %v612_v21   ;;  %643 = vperm.xlu1 %1419, %v613_v22  }
  0x1f   : > { %1370 = vmatmul.mubr.msk.bf16.gmra.mrb[4].mxu0 %vm342_vm1, %v1425_v18  ;;  %1375 = vmatmul.mubr.msk.bf16.gmra.mrb[4].mxu1 %vm342_vm1, %v1425_v18 }
  0x20   : > { %420 = vmatprep.mubr.bf16.mxu0 %v1460_v0  ;;  %493 = vmatprep.mubr.bf16.mxu1 %v1460_v0 }
  0x21   : > { %648 = vperm.xlu0 %1418, %v614_v24   ;;  %653 = vperm.xlu1 %1419, %v615_v25  }
  0x25   : > { %658 = vperm.xlu0 %1418, %v616_v26   ;;  %663 = vperm.xlu1 %1419, %v617_v27  }
  0x27   : > { %1371 = vmatmul.mubr.msk.bf16.gmra.mrb[8].mxu0 %vm342_vm1, %v1426_v23  ;;  %1376 = vmatmul.mubr.msk.bf16.gmra.mrb[8].mxu1 %vm342_vm1, %v1426_v23 }
  0x28   : > { %430 = vmatprep.mubr.bf16.mxu0 %v1460_v0  ;;  %503 = vmatprep.mubr.bf16.mxu1 %v1460_v0 }
  0x29   : > { %668 = vperm.xlu0 %1418, %v618_v29   ;;  %673 = vperm.xlu1 %1419, %v619_v30  }
  0x2d   : > { %678 = vperm.xlu0 %1418, %v620_v31   ;;  %683 = vperm.xlu1 %1419, %v621_v32  }
  0x2f   : > { %1372 = vmatmul.mubr.msk.bf16.gmra.mrb[12].mxu0 %vm342_vm1, %v1427_v28  ;;  %1377 = vmatmul.mubr.msk.bf16.gmra.mrb[12].mxu1 %vm342_vm1, %v1427_v28 }
  0x30   : > { %803 = vmatprep.mubr.bf16.mxu0 %v1460_v0  ;;  %916 = vmatprep.mubr.bf16.mxu1 %v1460_v0 }
  0x31   : > { %688 = vperm.xlu0 %1418, %v622_v33   ;;  %693 = vperm.xlu1 %1419, %v623_v34  }
  0x35   : > { %698 = vperm.xlu0 %1418, %v624_v35   ;;  %703 = vperm.xlu1 %1419, %v625_v36  }
  0x87   : > { %v275_v37 = vpop.permute.xlu0 %274  ;;  %v285_v39 = vpop.permute.xlu1 %284 }
  0x8b   : > { %v280_v38 = vpop.permute.xlu0 %279  ;;  %v290_v1 = vpop.permute.xlu1 %289 }
  0xea   : > { %v402_v40 = vpop.f32.mrb[0].mxu0  ;;  %v475_v41 = vpop.f32.mrb[0].mxu1 }
  0xeb   : > { %v403_v42 = vadd.f32 %v402_v40, %v275_v37  ;;  %v476_v43 = vadd.f32 %v475_v41, %v275_v37  ;;  %v404_v44 = vpop.f32.mrb[1].mxu0  ;;  %v477_v45 = vpop.f32.mrb[1].mxu1 }
  0xec   : > { %v405_v46 = vadd.f32 %v404_v44, %v275_v37  ;;  %v478_v47 = vadd.f32 %v477_v45, %v275_v37  ;;  %v406_v48 = vpop.f32.mrb[2].mxu0  ;;  %v479_v49 = vpop.f32.mrb[2].mxu1 }
  0xed   : > { %v514_v50 = vmul.f32 0.2, %v403_v42  ;;  %v516_v51 = vmul.f32 0.2, %v476_v43  ;;  %v407_v52 = vadd.f32 %v406_v48, %v280_v38  ;;  %v480_v53 = vadd.f32 %v479_v49, %v280_v38  ;;  %v408_v54 = vpop.f32.mrb[3].mxu0  ;;  %v481_v55 = vpop.f32.mrb[3].mxu1 }
  0xee   : > { %v515_v56 = vmul.f32 0.2, %v405_v46  ;;  %v517_v57 = vmul.f32 0.2, %v478_v47  ;;  %v409_v58 = vadd.f32 %v408_v54, %v280_v38  ;;  %v482_v59 = vadd.f32 %v481_v55, %v280_v38  ;;  %v295_v38 = vpop.permute.xlu0 %294 }
  0xef   : > { %v518_v60 = vmul.f32 0.2, %v407_v52  ;;  %v520_v61 = vmul.f32 0.2, %v480_v53  ;;  %v546_v2 = vmax.f32 %v403_v42, %v514_v50  ;;  %v548_v3 = vmax.f32 %v476_v43, %v516_v51 }
  0xf0   : > { %v519_v62 = vmul.f32 0.2, %v409_v58  ;;  %v521_v63 = vmul.f32 0.2, %v482_v59  ;;  %v547_v6 = vmax.f32 %v405_v46, %v515_v56  ;;  %v549_v7 = vmax.f32 %v478_v47, %v517_v57 }
  0xf1   : > { %v550_v4 = vmax.f32 %v407_v52, %v518_v60  ;;  %v552_v5 = vmax.f32 %v480_v53, %v520_v61 }
  0xf2   : > { %v551_v8 = vmax.f32 %v409_v58, %v519_v62  ;;  %v553_v9 = vmax.f32 %v482_v59, %v521_v63  ;;  %v412_v10 = vpop.f32.mrb[4].mxu0  ;;  %v485_v11 = vpop.f32.mrb[4].mxu1 }
  0xf3   : > { %v594_v12 = vpack.c.bf16 %v550_v4, %v546_v2  ;;  %v596_v13 = vpack.c.bf16 %v552_v5, %v548_v3  ;;  %v413_v14 = vadd.f32 %v412_v10, %v285_v39  ;;  %v486_v15 = vadd.f32 %v485_v11, %v285_v39  ;;  %v414_v16 = vpop.f32.mrb[5].mxu0  ;;  %v487_v17 = vpop.f32.mrb[5].mxu1 }
  0xf4   : > { %v415_v18 = vadd.f32 %v414_v16, %v285_v39  ;;  %v488_v19 = vadd.f32 %v487_v17, %v285_v39  ;;  %v416_v20 = vpop.f32.mrb[6].mxu0  ;;  %v489_v21 = vpop.f32.mrb[6].mxu1  ;;  %v595_v22 = vpack.c.bf16 %v551_v8, %v547_v6  ;;  %v597_v23 = vpack.c.bf16 %v553_v9, %v549_v7 }
  0xf5   : > { %v522_v24 = vmul.f32 0.2, %v413_v14  ;;  %v524_v25 = vmul.f32 0.2, %v486_v15  ;;  %v417_v26 = vadd.f32 %v416_v20, %v290_v1  ;;  %v490_v27 = vadd.f32 %v489_v21, %v290_v1  ;;  %v418_v28 = vpop.f32.mrb[7].mxu0  ;;  %v491_v29 = vpop.f32.mrb[7].mxu1 }
  0xf6   : > { %v523_v30 = vmul.f32 0.2, %v415_v18  ;;  %v525_v31 = vmul.f32 0.2, %v488_v19  ;;  %v419_v32 = vadd.f32 %v418_v28, %v290_v1  ;;  %v492_v33 = vadd.f32 %v491_v29, %v290_v1  ;;  %771 = vmatprep.subr.bf16.mxu0 %v595_v22  ;;  %884 = vmatprep.subr.bf16.mxu1 %v597_v23  ;;  %v300_v39 = vpop.permute.xlu1 %299 }
  0xf7   : > { %v526_v34 = vmul.f32 0.2, %v417_v26  ;;  %v528_v35 = vmul.f32 0.2, %v490_v27  ;;  %772 = vmatpush1.bf16.msra.mxu0 %v594_v12  ;;  %885 = vmatpush1.bf16.msra.mxu1 %v596_v13  ;;  %v554_v40 = vmax.f32 %v413_v14, %v522_v24  ;;  %v556_v41 = vmax.f32 %v486_v15, %v524_v25  ;;  %v305_v13 = vpop.permute.xlu0 %304 }
  0xf8   : > { %v527_v36 = vmul.f32 0.2, %v419_v32  ;;  %v529_v37 = vmul.f32 0.2, %v492_v33  ;;  %v555_v44 = vmax.f32 %v415_v18, %v523_v30  ;;  %v557_v45 = vmax.f32 %v488_v19, %v525_v31 }
  0xf9   : > { %v558_v42 = vmax.f32 %v417_v26, %v526_v34  ;;  %v560_v43 = vmax.f32 %v490_v27, %v528_v35 }
  0xfa   : > { %v559_v46 = vmax.f32 %v419_v32, %v527_v36  ;;  %v561_v47 = vmax.f32 %v492_v33, %v529_v37  ;;  %v422_v48 = vpop.f32.mrb[8].mxu0  ;;  %v495_v49 = vpop.f32.mrb[8].mxu1 }
  0xfb   : > { %v598_v50 = vpack.c.bf16 %v558_v42, %v554_v40  ;;  %v600_v51 = vpack.c.bf16 %v560_v43, %v556_v41  ;;  %v423_v52 = vadd.f32 %v422_v48, %v295_v38  ;;  %v496_v53 = vadd.f32 %v495_v49, %v295_v38  ;;  %v424_v54 = vpop.f32.mrb[9].mxu0  ;;  %v497_v55 = vpop.f32.mrb[9].mxu1 }
  0xfc   : > { %v425_v56 = vadd.f32 %v424_v54, %v295_v38  ;;  %v498_v57 = vadd.f32 %v497_v55, %v295_v38  ;;  %v426_v58 = vpop.f32.mrb[10].mxu0  ;;  %v499_v59 = vpop.f32.mrb[10].mxu1  ;;  %v599_v60 = vpack.c.bf16 %v559_v46, %v555_v44  ;;  %v601_v61 = vpack.c.bf16 %v561_v47, %v557_v45 }
  0xfd   : > { %v530_v62 = vmul.f32 0.2, %v423_v52  ;;  %v532_v63 = vmul.f32 0.2, %v496_v53  ;;  %v427_v1 = vadd.f32 %v426_v58, %v300_v39  ;;  %v500_v2 = vadd.f32 %v499_v59, %v300_v39  ;;  %v428_v3 = vpop.f32.mrb[11].mxu0  ;;  %v501_v4 = vpop.f32.mrb[11].mxu1 }
  0xfe   : > { %v531_v5 = vmul.f32 0.2, %v425_v56  ;;  %v533_v6 = vmul.f32 0.2, %v498_v57  ;;  %v429_v7 = vadd.f32 %v428_v3, %v300_v39  ;;  %v502_v8 = vadd.f32 %v501_v4, %v300_v39  ;;  %773 = vmatprep.subr.bf16.mxu0 %v599_v60  ;;  %886 = vmatprep.subr.bf16.mxu1 %v601_v61  ;;  %v310_v14 = vpop.permute.xlu1 %309  ;;  %v1431_v3 = vld [vmem:[%s1684_s3 + $0x18] sm:$0xff]   ;;  %v1432_v4 = vld [vmem:[%s1684_s3 + $0x20] sm:$0xff]  }
  0xff   : > { %v534_v9 = vmul.f32 0.2, %v427_v1  ;;  %v536_v10 = vmul.f32 0.2, %v500_v2  ;;  %774 = vmatpush1.bf16.msra.mxu0 %v598_v50  ;;  %887 = vmatpush1.bf16.msra.mxu1 %v600_v51  ;;  %v562_v15 = vmax.f32 %v423_v52, %v530_v62  ;;  %v564_v16 = vmax.f32 %v496_v53, %v532_v63  ;;  %v1428_v63 = vld [vmem:[%s1684_s3] sm:$0xff]  }
 0x100   : > { %v535_v11 = vmul.f32 0.2, %v429_v7  ;;  %v537_v12 = vmul.f32 0.2, %v502_v8  ;;  %v563_v19 = vmax.f32 %v425_v56, %v531_v5  ;;  %v565_v20 = vmax.f32 %v498_v57, %v533_v6  ;;  %v1433_v5 = vld [vmem:[%s1684_s3 + $0x28] sm:$0xff]   ;;  %v1434_v6 = vld [vmem:[%s1684_s3 + $0x30] sm:$0xff]  }
 0x101   : > { %v566_v17 = vmax.f32 %v427_v1, %v534_v9  ;;  %v568_v18 = vmax.f32 %v500_v2, %v536_v10  ;;  %v1429_v1 = vld [vmem:[%s1684_s3 + $0x8] sm:$0xff]   ;;  %v1430_v2 = vld [vmem:[%s1684_s3 + $0x10] sm:$0xff]  }
 0x102   : > { %v567_v21 = vmax.f32 %v429_v7, %v535_v11  ;;  %v569_v22 = vmax.f32 %v502_v8, %v537_v12  ;;  %v432_v23 = vpop.f32.mrb[12].mxu0  ;;  %v505_v24 = vpop.f32.mrb[12].mxu1  ;;  %v1435_v7 = vld [vmem:[%s1684_s3 + $0x38] sm:$0xff]  }
 0x103   : > { %v602_v25 = vpack.c.bf16 %v566_v17, %v562_v15  ;;  %v604_v26 = vpack.c.bf16 %v568_v18, %v564_v16  ;;  %v433_v27 = vadd.f32 %v432_v23, %v305_v13  ;;  %v506_v28 = vadd.f32 %v505_v24, %v305_v13  ;;  %v434_v29 = vpop.f32.mrb[13].mxu0  ;;  %v507_v30 = vpop.f32.mrb[13].mxu1 }
 0x104   : > { %v435_v31 = vadd.f32 %v434_v29, %v305_v13  ;;  %v508_v32 = vadd.f32 %v507_v30, %v305_v13  ;;  %v436_v33 = vpop.f32.mrb[14].mxu0  ;;  %v509_v34 = vpop.f32.mrb[14].mxu1  ;;  %v603_v35 = vpack.c.bf16 %v567_v21, %v563_v19  ;;  %v605_v36 = vpack.c.bf16 %v569_v22, %v565_v20 }
 0x105   : > { %v538_v37 = vmul.f32 0.2, %v433_v27  ;;  %v540_v38 = vmul.f32 0.2, %v506_v28  ;;  %v437_v39 = vadd.f32 %v436_v33, %v310_v14  ;;  %v510_v40 = vadd.f32 %v509_v34, %v310_v14  ;;  %v438_v41 = vpop.f32.mrb[15].mxu0  ;;  %v511_v42 = vpop.f32.mrb[15].mxu1 }
 0x106   : > { %v539_v43 = vmul.f32 0.2, %v435_v31  ;;  %v541_v44 = vmul.f32 0.2, %v508_v32  ;;  %v439_v45 = vadd.f32 %v438_v41, %v310_v14  ;;  %v512_v46 = vadd.f32 %v511_v42, %v310_v14  ;;  %775 = vmatprep.subr.bf16.mxu0 %v603_v35  ;;  %888 = vmatprep.subr.bf16.mxu1 %v605_v36  ;;  %v629_v8 = vpop.permute.xlu0 %628  ;;  %v634_v9 = vpop.permute.xlu1 %633 }
 0x107   : > { %v542_v47 = vmul.f32 0.2, %v437_v39  ;;  %v544_v48 = vmul.f32 0.2, %v510_v40  ;;  %776 = vmatpush1.bf16.msra.mxu0 %v602_v25  ;;  %889 = vmatpush1.bf16.msra.mxu1 %v604_v26  ;;  %v570_v51 = vmax.f32 %v433_v27, %v538_v37  ;;  %v572_v52 = vmax.f32 %v506_v28, %v540_v38 }
 0x108   : > { %v543_v49 = vmul.f32 0.2, %v439_v45  ;;  %v545_v50 = vmul.f32 0.2, %v512_v46  ;;  %v571_v55 = vmax.f32 %v435_v31, %v539_v43  ;;  %v573_v56 = vmax.f32 %v508_v32, %v541_v44 }
 0x109   : > { %v574_v53 = vmax.f32 %v437_v39, %v542_v47  ;;  %v576_v54 = vmax.f32 %v510_v40, %v544_v48 }
 0x10a   : > { %v575_v57 = vmax.f32 %v439_v45, %v543_v49  ;;  %v577_v58 = vmax.f32 %v512_v46, %v545_v50  ;;  %v639_v33 = vpop.permute.xlu0 %638  ;;  %v644_v34 = vpop.permute.xlu1 %643 }
 0x10b   : > { %v606_v59 = vpack.c.bf16 %v574_v53, %v570_v51  ;;  %v608_v60 = vpack.c.bf16 %v576_v54, %v572_v52 }
 0x10c   : > { %v607_v61 = vpack.c.bf16 %v575_v57, %v571_v55  ;;  %v609_v62 = vpack.c.bf16 %v577_v58, %v573_v56 }
 0x10e   : > { %777 = vmatprep.subr.bf16.mxu0 %v607_v61  ;;  %890 = vmatprep.subr.bf16.mxu1 %v609_v62 }
 0x10f   : > { %778 = vmatpush1.bf16.msra.mxu0 %v606_v59  ;;  %891 = vmatpush1.bf16.msra.mxu1 %v608_v60 }
 0x112   : > { %1386 = vmatmul.mubr.msk.bf16.vlgmr.msra.gmra.mrb[16].mxu0 %vm746_vm2, %v1428_v63  ;;  %1394 = vmatmul.mubr.msk.bf16.vlgmr.msra.gmra.mrb[16].mxu1 %vm746_vm2, %v1428_v63 }
 0x113   : > { %813 = vmatprep.mubr.bf16.mxu0 %v1460_v0  ;;  %926 = vmatprep.mubr.bf16.mxu1 %v1460_v0 }
 0x11a   : > { %1387 = vmatmul.mubr.msk.bf16.gmra.mrb[20].mxu0 %vm746_vm2, %v1429_v1  ;;  %1395 = vmatmul.mubr.msk.bf16.gmra.mrb[20].mxu1 %vm746_vm2, %v1429_v1 }
 0x11b   : > { %823 = vmatprep.mubr.bf16.mxu0 %v1460_v0  ;;  %936 = vmatprep.mubr.bf16.mxu1 %v1460_v0 }
 0x122   : > { %1388 = vmatmul.mubr.msk.bf16.gmra.mrb[24].mxu0 %vm746_vm2, %v1430_v2  ;;  %1396 = vmatmul.mubr.msk.bf16.gmra.mrb[24].mxu1 %vm746_vm2, %v1430_v2 }
 0x123   : > { %833 = vmatprep.mubr.bf16.mxu0 %v1460_v0  ;;  %946 = vmatprep.mubr.bf16.mxu1 %v1460_v0 }
 0x12a   : > { %1389 = vmatmul.mubr.msk.bf16.gmra.mrb[28].mxu0 %vm746_vm2, %v1431_v3  ;;  %1397 = vmatmul.mubr.msk.bf16.gmra.mrb[28].mxu1 %vm746_vm2, %v1431_v3 }
 0x12b   : > { %843 = vmatprep.mubr.bf16.mxu0 %v1460_v0  ;;  %956 = vmatprep.mubr.bf16.mxu1 %v1460_v0 }
 0x132   : > { %1390 = vmatmul.mubr.msk.bf16.gmra.mrb[32].mxu0 %vm746_vm2, %v1432_v4  ;;  %1398 = vmatmul.mubr.msk.bf16.gmra.mrb[32].mxu1 %vm746_vm2, %v1432_v4 }
 0x133   : > { %853 = vmatprep.mubr.bf16.mxu0 %v1460_v0  ;;  %966 = vmatprep.mubr.bf16.mxu1 %v1460_v0 }
 0x13a   : > { %1391 = vmatmul.mubr.msk.bf16.gmra.mrb[36].mxu0 %vm746_vm2, %v1433_v5  ;;  %1399 = vmatmul.mubr.msk.bf16.gmra.mrb[36].mxu1 %vm746_vm2, %v1433_v5 }
 0x13b   : > { %863 = vmatprep.mubr.bf16.mxu0 %v1460_v0  ;;  %976 = vmatprep.mubr.bf16.mxu1 %v1460_v0 }
 0x142   : > { %1392 = vmatmul.mubr.msk.bf16.gmra.mrb[40].mxu0 %vm746_vm2, %v1434_v6  ;;  %1400 = vmatmul.mubr.msk.bf16.gmra.mrb[40].mxu1 %vm746_vm2, %v1434_v6 }
 0x143   : > { %873 = vmatprep.mubr.bf16.mxu0 %v1460_v0  ;;  %986 = vmatprep.mubr.bf16.mxu1 %v1460_v0 }
 0x14a   : > { %1393 = vmatmul.mubr.msk.bf16.gmra.mrb[44].mxu0 %vm746_vm2, %v1435_v7  ;;  %1401 = vmatmul.mubr.msk.bf16.gmra.mrb[44].mxu1 %vm746_vm2, %v1435_v7 }
 0x14b   : > { %1190 = vmatprep.mubr.bf16.mxu0 %v1460_v0  ;;  %1231 = vmatprep.mubr.bf16.mxu1 %v1460_v0 }
 0x1e5   : > { %v805_v10 = vpop.f32.mrb[16].mxu0  ;;  %v918_v11 = vpop.f32.mrb[16].mxu1 }
 0x1e6   : > { %v806_v12 = vadd.f32 %v805_v10, %v629_v8  ;;  %v919_v13 = vadd.f32 %v918_v11, %v629_v8  ;;  %v807_v14 = vpop.f32.mrb[17].mxu0  ;;  %v920_v15 = vpop.f32.mrb[17].mxu1 }
 0x1e7   : > { %v808_v16 = vadd.f32 %v807_v14, %v629_v8  ;;  %v921_v17 = vadd.f32 %v920_v15, %v629_v8  ;;  %v809_v18 = vpop.f32.mrb[18].mxu0  ;;  %v922_v19 = vpop.f32.mrb[18].mxu1 }
 0x1e8   : > { %v997_v20 = vmul.f32 0.2, %v806_v12  ;;  %v999_v21 = vmul.f32 0.2, %v919_v13  ;;  %v810_v22 = vadd.f32 %v809_v18, %v634_v9  ;;  %v923_v23 = vadd.f32 %v922_v19, %v634_v9  ;;  %v811_v24 = vpop.f32.mrb[19].mxu0  ;;  %v924_v25 = vpop.f32.mrb[19].mxu1 }
 0x1e9   : > { %v998_v26 = vmul.f32 0.2, %v808_v16  ;;  %v1000_v0 = vmul.f32 0.2, %v921_v17  ;;  %v812_v27 = vadd.f32 %v811_v24, %v634_v9  ;;  %v925_v28 = vadd.f32 %v924_v25, %v634_v9  ;;  %v649_v8 = vpop.permute.xlu0 %648  ;;  %v654_v9 = vpop.permute.xlu1 %653 }
 0x1ea   : > { %v1001_v29 = vmul.f32 0.2, %v810_v22  ;;  %v1003_v30 = vmul.f32 0.2, %v923_v23  ;;  %v1061_v35 = vmax.f32 %v806_v12, %v997_v20  ;;  %v1063_v36 = vmax.f32 %v919_v13, %v999_v21 }
 0x1eb   : > { %v1002_v31 = vmul.f32 0.2, %v812_v27  ;;  %v1004_v32 = vmul.f32 0.2, %v925_v28  ;;  %v1062_v39 = vmax.f32 %v808_v16, %v998_v26  ;;  %v1064_v40 = vmax.f32 %v921_v17, %v1000_v0 }
 0x1ec   : > { %v1065_v37 = vmax.f32 %v810_v22, %v1001_v29  ;;  %v1067_v38 = vmax.f32 %v923_v23, %v1003_v30 }
 0x1ed   : > { %v1066_v41 = vmax.f32 %v812_v27, %v1002_v31  ;;  %v1068_v42 = vmax.f32 %v925_v28, %v1004_v32  ;;  %v815_v43 = vpop.f32.mrb[20].mxu0  ;;  %v928_v44 = vpop.f32.mrb[20].mxu1 }
 0x1ee   : > { %v1126_v45 = vpack.c.bf16 %v1065_v37, %v1061_v35  ;;  %v1128_v46 = vpack.c.bf16 %v1067_v38, %v1063_v36  ;;  %v816_v47 = vadd.f32 %v815_v43, %v639_v33  ;;  %v929_v48 = vadd.f32 %v928_v44, %v639_v33  ;;  %v817_v49 = vpop.f32.mrb[21].mxu0  ;;  %v930_v50 = vpop.f32.mrb[21].mxu1 }
 0x1ef   : > { %v818_v51 = vadd.f32 %v817_v49, %v639_v33  ;;  %v931_v52 = vadd.f32 %v930_v50, %v639_v33  ;;  %v819_v53 = vpop.f32.mrb[22].mxu0  ;;  %v932_v54 = vpop.f32.mrb[22].mxu1  ;;  %v1127_v55 = vpack.c.bf16 %v1066_v41, %v1062_v39  ;;  %v1129_v56 = vpack.c.bf16 %v1068_v42, %v1064_v40 }
 0x1f0   : > { %v1005_v57 = vmul.f32 0.2, %v816_v47  ;;  %v1007_v58 = vmul.f32 0.2, %v929_v48  ;;  %v820_v59 = vadd.f32 %v819_v53, %v644_v34  ;;  %v933_v60 = vadd.f32 %v932_v54, %v644_v34  ;;  %v821_v61 = vpop.f32.mrb[23].mxu0  ;;  %v934_v62 = vpop.f32.mrb[23].mxu1 }
 0x1f1   : > { %v1006_v63 = vmul.f32 0.2, %v818_v51  ;;  %v1008_v1 = vmul.f32 0.2, %v931_v52  ;;  %v822_v2 = vadd.f32 %v821_v61, %v644_v34  ;;  %v935_v3 = vadd.f32 %v934_v62, %v644_v34  ;;  %1158 = vmatprep.subr.bf16.mxu0 %v1127_v55  ;;  %1199 = vmatprep.subr.bf16.mxu1 %v1129_v56 }
 0x1f2   : > { %v1009_v4 = vmul.f32 0.2, %v820_v59  ;;  %v1011_v5 = vmul.f32 0.2, %v933_v60  ;;  %1159 = vmatpush1.bf16.msra.mxu0 %v1126_v45  ;;  %1200 = vmatpush1.bf16.msra.mxu1 %v1128_v46  ;;  %v1069_v10 = vmax.f32 %v816_v47, %v1005_v57  ;;  %v1071_v11 = vmax.f32 %v929_v48, %v1007_v58  ;;  %v659_v45 = vpop.permute.xlu0 %658  ;;  %v664_v46 = vpop.permute.xlu1 %663 }
 0x1f3   : > { %v1010_v6 = vmul.f32 0.2, %v822_v2  ;;  %v1012_v7 = vmul.f32 0.2, %v935_v3  ;;  %v1070_v14 = vmax.f32 %v818_v51, %v1006_v63  ;;  %v1072_v15 = vmax.f32 %v931_v52, %v1008_v1 }
 0x1f4   : > { %v1073_v12 = vmax.f32 %v820_v59, %v1009_v4  ;;  %v1075_v13 = vmax.f32 %v933_v60, %v1011_v5 }
 0x1f5   : > { %v1074_v16 = vmax.f32 %v822_v2, %v1010_v6  ;;  %v1076_v17 = vmax.f32 %v935_v3, %v1012_v7  ;;  %v825_v18 = vpop.f32.mrb[24].mxu0  ;;  %v938_v19 = vpop.f32.mrb[24].mxu1 }
 0x1f6   : > { %v1130_v20 = vpack.c.bf16 %v1073_v12, %v1069_v10  ;;  %v1132_v21 = vpack.c.bf16 %v1075_v13, %v1071_v11  ;;  %v826_v22 = vadd.f32 %v825_v18, %v649_v8  ;;  %v939_v23 = vadd.f32 %v938_v19, %v649_v8  ;;  %v827_v24 = vpop.f32.mrb[25].mxu0  ;;  %v940_v25 = vpop.f32.mrb[25].mxu1 }
 0x1f7   : > { %v828_v26 = vadd.f32 %v827_v24, %v649_v8  ;;  %v941_v0 = vadd.f32 %v940_v25, %v649_v8  ;;  %v829_v27 = vpop.f32.mrb[26].mxu0  ;;  %v942_v28 = vpop.f32.mrb[26].mxu1  ;;  %v1131_v29 = vpack.c.bf16 %v1074_v16, %v1070_v14  ;;  %v1133_v30 = vpack.c.bf16 %v1076_v17, %v1072_v15 }
 0x1f8   : > { %v1013_v31 = vmul.f32 0.2, %v826_v22  ;;  %v1015_v32 = vmul.f32 0.2, %v939_v23  ;;  %v830_v33 = vadd.f32 %v829_v27, %v654_v9  ;;  %v943_v34 = vadd.f32 %v942_v28, %v654_v9  ;;  %v831_v35 = vpop.f32.mrb[27].mxu0  ;;  %v944_v36 = vpop.f32.mrb[27].mxu1 }
 0x1f9   : > { %v1014_v37 = vmul.f32 0.2, %v828_v26  ;;  %v1016_v38 = vmul.f32 0.2, %v941_v0  ;;  %v832_v39 = vadd.f32 %v831_v35, %v654_v9  ;;  %v945_v40 = vadd.f32 %v944_v36, %v654_v9  ;;  %1160 = vmatprep.subr.bf16.mxu0 %v1131_v29  ;;  %1201 = vmatprep.subr.bf16.mxu1 %v1133_v30 }
 0x1fa   : > { %v1017_v41 = vmul.f32 0.2, %v830_v33  ;;  %v1019_v42 = vmul.f32 0.2, %v943_v34  ;;  %1161 = vmatpush1.bf16.msra.mxu0 %v1130_v20  ;;  %1202 = vmatpush1.bf16.msra.mxu1 %v1132_v21  ;;  %v1077_v47 = vmax.f32 %v826_v22, %v1013_v31  ;;  %v1079_v48 = vmax.f32 %v939_v23, %v1015_v32  ;;  %v669_v20 = vpop.permute.xlu0 %668  ;;  %v674_v21 = vpop.permute.xlu1 %673 }
 0x1fb   : > { %v1018_v43 = vmul.f32 0.2, %v832_v39  ;;  %v1020_v44 = vmul.f32 0.2, %v945_v40  ;;  %v1078_v51 = vmax.f32 %v828_v26, %v1014_v37  ;;  %v1080_v52 = vmax.f32 %v941_v0, %v1016_v38 }
 0x1fc   : > { %v1081_v49 = vmax.f32 %v830_v33, %v1017_v41  ;;  %v1083_v50 = vmax.f32 %v943_v34, %v1019_v42 }
 0x1fd   : > { %v1082_v53 = vmax.f32 %v832_v39, %v1018_v43  ;;  %v1084_v54 = vmax.f32 %v945_v40, %v1020_v44  ;;  %v835_v55 = vpop.f32.mrb[28].mxu0  ;;  %v948_v56 = vpop.f32.mrb[28].mxu1 }
 0x1fe   : > { %v1134_v57 = vpack.c.bf16 %v1081_v49, %v1077_v47  ;;  %v1136_v58 = vpack.c.bf16 %v1083_v50, %v1079_v48  ;;  %v836_v59 = vadd.f32 %v835_v55, %v659_v45  ;;  %v949_v60 = vadd.f32 %v948_v56, %v659_v45  ;;  %v837_v61 = vpop.f32.mrb[29].mxu0  ;;  %v950_v62 = vpop.f32.mrb[29].mxu1 }
 0x1ff   : > { %v838_v63 = vadd.f32 %v837_v61, %v659_v45  ;;  %v951_v1 = vadd.f32 %v950_v62, %v659_v45  ;;  %v839_v2 = vpop.f32.mrb[30].mxu0  ;;  %v952_v3 = vpop.f32.mrb[30].mxu1  ;;  %v1135_v4 = vpack.c.bf16 %v1082_v53, %v1078_v51  ;;  %v1137_v5 = vpack.c.bf16 %v1084_v54, %v1080_v52 }
 0x200   : > { %v1021_v6 = vmul.f32 0.2, %v836_v59  ;;  %v1023_v7 = vmul.f32 0.2, %v949_v60  ;;  %v840_v8 = vadd.f32 %v839_v2, %v664_v46  ;;  %v953_v9 = vadd.f32 %v952_v3, %v664_v46  ;;  %v841_v10 = vpop.f32.mrb[31].mxu0  ;;  %v954_v11 = vpop.f32.mrb[31].mxu1 }
 0x201   : > { %v1022_v12 = vmul.f32 0.2, %v838_v63  ;;  %v1024_v13 = vmul.f32 0.2, %v951_v1  ;;  %v842_v14 = vadd.f32 %v841_v10, %v664_v46  ;;  %v955_v15 = vadd.f32 %v954_v11, %v664_v46  ;;  %1162 = vmatprep.subr.bf16.mxu0 %v1135_v4  ;;  %1203 = vmatprep.subr.bf16.mxu1 %v1137_v5 }
 0x202   : > { %v1025_v16 = vmul.f32 0.2, %v840_v8  ;;  %v1027_v17 = vmul.f32 0.2, %v953_v9  ;;  %1163 = vmatpush1.bf16.msra.mxu0 %v1134_v57  ;;  %1204 = vmatpush1.bf16.msra.mxu1 %v1136_v58  ;;  %v1085_v22 = vmax.f32 %v836_v59, %v1021_v6  ;;  %v1087_v23 = vmax.f32 %v949_v60, %v1023_v7  ;;  %v679_v57 = vpop.permute.xlu0 %678  ;;  %v684_v58 = vpop.permute.xlu1 %683 }
 0x203   : > { %v1026_v18 = vmul.f32 0.2, %v842_v14  ;;  %v1028_v19 = vmul.f32 0.2, %v955_v15  ;;  %v1086_v26 = vmax.f32 %v838_v63, %v1022_v12  ;;  %v1088_v0 = vmax.f32 %v951_v1, %v1024_v13 }
 0x204   : > { %v1089_v24 = vmax.f32 %v840_v8, %v1025_v16  ;;  %v1091_v25 = vmax.f32 %v953_v9, %v1027_v17 }
 0x205   : > { %v1090_v27 = vmax.f32 %v842_v14, %v1026_v18  ;;  %v1092_v28 = vmax.f32 %v955_v15, %v1028_v19  ;;  %v845_v29 = vpop.f32.mrb[32].mxu0  ;;  %v958_v30 = vpop.f32.mrb[32].mxu1 }
 0x206   : > { %v1138_v31 = vpack.c.bf16 %v1089_v24, %v1085_v22  ;;  %v1140_v32 = vpack.c.bf16 %v1091_v25, %v1087_v23  ;;  %v846_v33 = vadd.f32 %v845_v29, %v669_v20  ;;  %v959_v34 = vadd.f32 %v958_v30, %v669_v20  ;;  %v847_v35 = vpop.f32.mrb[33].mxu0  ;;  %v960_v36 = vpop.f32.mrb[33].mxu1 }
 0x207   : > { %v848_v37 = vadd.f32 %v847_v35, %v669_v20  ;;  %v961_v38 = vadd.f32 %v960_v36, %v669_v20  ;;  %v849_v39 = vpop.f32.mrb[34].mxu0  ;;  %v962_v40 = vpop.f32.mrb[34].mxu1  ;;  %v1139_v41 = vpack.c.bf16 %v1090_v27, %v1086_v26  ;;  %v1141_v42 = vpack.c.bf16 %v1092_v28, %v1088_v0 }
 0x208   : > { %v1029_v43 = vmul.f32 0.2, %v846_v33  ;;  %v1031_v44 = vmul.f32 0.2, %v959_v34  ;;  %v850_v45 = vadd.f32 %v849_v39, %v674_v21  ;;  %v963_v46 = vadd.f32 %v962_v40, %v674_v21  ;;  %v851_v47 = vpop.f32.mrb[35].mxu0  ;;  %v964_v48 = vpop.f32.mrb[35].mxu1 }
 0x209   : > { %v1030_v49 = vmul.f32 0.2, %v848_v37  ;;  %v1032_v50 = vmul.f32 0.2, %v961_v38  ;;  %v852_v51 = vadd.f32 %v851_v47, %v674_v21  ;;  %v965_v52 = vadd.f32 %v964_v48, %v674_v21  ;;  %1164 = vmatprep.subr.bf16.mxu0 %v1139_v41  ;;  %1205 = vmatprep.subr.bf16.mxu1 %v1141_v42 }
 0x20a   : > { %v1033_v53 = vmul.f32 0.2, %v850_v45  ;;  %v1035_v54 = vmul.f32 0.2, %v963_v46  ;;  %1165 = vmatpush1.bf16.msra.mxu0 %v1138_v31  ;;  %1206 = vmatpush1.bf16.msra.mxu1 %v1140_v32  ;;  %v1093_v59 = vmax.f32 %v846_v33, %v1029_v43  ;;  %v1095_v60 = vmax.f32 %v959_v34, %v1031_v44  ;;  %v689_v31 = vpop.permute.xlu0 %688  ;;  %v694_v32 = vpop.permute.xlu1 %693 }
 0x20b   : > { %v1034_v55 = vmul.f32 0.2, %v852_v51  ;;  %v1036_v56 = vmul.f32 0.2, %v965_v52  ;;  %v1094_v63 = vmax.f32 %v848_v37, %v1030_v49  ;;  %v1096_v1 = vmax.f32 %v961_v38, %v1032_v50 }
 0x20c   : > { %v1097_v61 = vmax.f32 %v850_v45, %v1033_v53  ;;  %v1099_v62 = vmax.f32 %v963_v46, %v1035_v54 }
 0x20d   : > { %v1098_v2 = vmax.f32 %v852_v51, %v1034_v55  ;;  %v1100_v3 = vmax.f32 %v965_v52, %v1036_v56  ;;  %v855_v4 = vpop.f32.mrb[36].mxu0  ;;  %v968_v5 = vpop.f32.mrb[36].mxu1 }
 0x20e   : > { %v1142_v6 = vpack.c.bf16 %v1097_v61, %v1093_v59  ;;  %v1144_v7 = vpack.c.bf16 %v1099_v62, %v1095_v60  ;;  %v856_v8 = vadd.f32 %v855_v4, %v679_v57  ;;  %v969_v9 = vadd.f32 %v968_v5, %v679_v57  ;;  %v857_v10 = vpop.f32.mrb[37].mxu0  ;;  %v970_v11 = vpop.f32.mrb[37].mxu1 }
 0x20f   : > { %v858_v12 = vadd.f32 %v857_v10, %v679_v57  ;;  %v971_v13 = vadd.f32 %v970_v11, %v679_v57  ;;  %v859_v14 = vpop.f32.mrb[38].mxu0  ;;  %v972_v15 = vpop.f32.mrb[38].mxu1  ;;  %v1143_v16 = vpack.c.bf16 %v1098_v2, %v1094_v63  ;;  %v1145_v17 = vpack.c.bf16 %v1100_v3, %v1096_v1 }
 0x210   : > { %v1037_v18 = vmul.f32 0.2, %v856_v8  ;;  %v1039_v19 = vmul.f32 0.2, %v969_v9  ;;  %v860_v20 = vadd.f32 %v859_v14, %v684_v58  ;;  %v973_v21 = vadd.f32 %v972_v15, %v684_v58  ;;  %v861_v22 = vpop.f32.mrb[39].mxu0  ;;  %v974_v23 = vpop.f32.mrb[39].mxu1 }
 0x211   : > { %v1038_v24 = vmul.f32 0.2, %v858_v12  ;;  %v1040_v25 = vmul.f32 0.2, %v971_v13  ;;  %v862_v26 = vadd.f32 %v861_v22, %v684_v58  ;;  %v975_v0 = vadd.f32 %v974_v23, %v684_v58  ;;  %1166 = vmatprep.subr.bf16.mxu0 %v1143_v16  ;;  %1207 = vmatprep.subr.bf16.mxu1 %v1145_v17 }
 0x212   : > { %v1041_v27 = vmul.f32 0.2, %v860_v20  ;;  %v1043_v28 = vmul.f32 0.2, %v973_v21  ;;  %1167 = vmatpush1.bf16.msra.mxu0 %v1142_v6  ;;  %1208 = vmatpush1.bf16.msra.mxu1 %v1144_v7  ;;  %v1101_v33 = vmax.f32 %v856_v8, %v1037_v18  ;;  %v1103_v34 = vmax.f32 %v969_v9, %v1039_v19  ;;  %v699_v6 = vpop.permute.xlu0 %698  ;;  %v704_v7 = vpop.permute.xlu1 %703 }
 0x213   : > { %v1042_v29 = vmul.f32 0.2, %v862_v26  ;;  %v1044_v30 = vmul.f32 0.2, %v975_v0  ;;  %v1102_v37 = vmax.f32 %v858_v12, %v1038_v24  ;;  %v1104_v38 = vmax.f32 %v971_v13, %v1040_v25 }
 0x214   : > { %v1105_v35 = vmax.f32 %v860_v20, %v1041_v27  ;;  %v1107_v36 = vmax.f32 %v973_v21, %v1043_v28 }
 0x215   : > { %v1106_v39 = vmax.f32 %v862_v26, %v1042_v29  ;;  %v1108_v40 = vmax.f32 %v975_v0, %v1044_v30  ;;  %v865_v41 = vpop.f32.mrb[40].mxu0  ;;  %v978_v42 = vpop.f32.mrb[40].mxu1 }
 0x216   : > { %v1146_v43 = vpack.c.bf16 %v1105_v35, %v1101_v33  ;;  %v1148_v44 = vpack.c.bf16 %v1107_v36, %v1103_v34  ;;  %v866_v45 = vadd.f32 %v865_v41, %v689_v31  ;;  %v979_v46 = vadd.f32 %v978_v42, %v689_v31  ;;  %v867_v47 = vpop.f32.mrb[41].mxu0  ;;  %v980_v48 = vpop.f32.mrb[41].mxu1 }
 0x217   : > { %v868_v49 = vadd.f32 %v867_v47, %v689_v31  ;;  %v981_v50 = vadd.f32 %v980_v48, %v689_v31  ;;  %v869_v51 = vpop.f32.mrb[42].mxu0  ;;  %v982_v52 = vpop.f32.mrb[42].mxu1  ;;  %v1147_v53 = vpack.c.bf16 %v1106_v39, %v1102_v37  ;;  %v1149_v54 = vpack.c.bf16 %v1108_v40, %v1104_v38 }
 0x218   : > { %v1045_v55 = vmul.f32 0.2, %v866_v45  ;;  %v1047_v56 = vmul.f32 0.2, %v979_v46  ;;  %v870_v57 = vadd.f32 %v869_v51, %v694_v32  ;;  %v983_v58 = vadd.f32 %v982_v52, %v694_v32  ;;  %v871_v59 = vpop.f32.mrb[43].mxu0  ;;  %v984_v60 = vpop.f32.mrb[43].mxu1 }
 0x219   : > { %v1046_v61 = vmul.f32 0.2, %v868_v49  ;;  %v1048_v62 = vmul.f32 0.2, %v981_v50  ;;  %v872_v63 = vadd.f32 %v871_v59, %v694_v32  ;;  %v985_v1 = vadd.f32 %v984_v60, %v694_v32  ;;  %1168 = vmatprep.subr.bf16.mxu0 %v1147_v53  ;;  %1209 = vmatprep.subr.bf16.mxu1 %v1149_v54 }
 0x21a   : > { %v1049_v2 = vmul.f32 0.2, %v870_v57  ;;  %v1051_v3 = vmul.f32 0.2, %v983_v58  ;;  %1169 = vmatpush1.bf16.msra.mxu0 %v1146_v43  ;;  %1210 = vmatpush1.bf16.msra.mxu1 %v1148_v44  ;;  %v1109_v8 = vmax.f32 %v866_v45, %v1045_v55  ;;  %v1111_v9 = vmax.f32 %v979_v46, %v1047_v56  ;;  %v1125_v55 = vld [vmem:[%s1686_s5] sm:$0x1] }
 0x21b   : > { %v1050_v4 = vmul.f32 0.2, %v872_v63  ;;  %v1052_v5 = vmul.f32 0.2, %v985_v1  ;;  %v1110_v12 = vmax.f32 %v868_v49, %v1046_v61  ;;  %v1112_v13 = vmax.f32 %v981_v50, %v1048_v62 }
 0x21c   : > { %v1113_v10 = vmax.f32 %v870_v57, %v1049_v2  ;;  %v1115_v11 = vmax.f32 %v983_v58, %v1051_v3 }
 0x21d   : > { %v1114_v14 = vmax.f32 %v872_v63, %v1050_v4  ;;  %v1116_v15 = vmax.f32 %v985_v1, %v1052_v5  ;;  %v875_v16 = vpop.f32.mrb[44].mxu0  ;;  %v988_v17 = vpop.f32.mrb[44].mxu1 }
 0x21e   : > { %v1150_v18 = vpack.c.bf16 %v1113_v10, %v1109_v8  ;;  %v1152_v19 = vpack.c.bf16 %v1115_v11, %v1111_v9  ;;  %v876_v20 = vadd.f32 %v875_v16, %v699_v6  ;;  %v989_v21 = vadd.f32 %v988_v17, %v699_v6  ;;  %v877_v22 = vpop.f32.mrb[45].mxu0  ;;  %v990_v23 = vpop.f32.mrb[45].mxu1 }
 0x21f   : > { %v878_v24 = vadd.f32 %v877_v22, %v699_v6  ;;  %v991_v25 = vadd.f32 %v990_v23, %v699_v6  ;;  %v879_v26 = vpop.f32.mrb[46].mxu0  ;;  %v992_v0 = vpop.f32.mrb[46].mxu1  ;;  %v1151_v27 = vpack.c.bf16 %v1114_v14, %v1110_v12  ;;  %v1153_v28 = vpack.c.bf16 %v1116_v15, %v1112_v13 }
 0x220   : > { %v1053_v29 = vmul.f32 0.2, %v876_v20  ;;  %v1055_v30 = vmul.f32 0.2, %v989_v21  ;;  %v880_v31 = vadd.f32 %v879_v26, %v704_v7  ;;  %v993_v32 = vadd.f32 %v992_v0, %v704_v7  ;;  %v881_v33 = vpop.f32.mrb[47].mxu0  ;;  %v994_v34 = vpop.f32.mrb[47].mxu1 }
 0x221   : > { %v1054_v35 = vmul.f32 0.2, %v878_v24  ;;  %v1056_v36 = vmul.f32 0.2, %v991_v25  ;;  %v882_v37 = vadd.f32 %v881_v33, %v704_v7  ;;  %v995_v38 = vadd.f32 %v994_v34, %v704_v7  ;;  %1170 = vmatprep.subr.bf16.mxu0 %v1151_v27  ;;  %1211 = vmatprep.subr.bf16.mxu1 %v1153_v28 }
 0x222   : > { %v1057_v39 = vmul.f32 0.2, %v880_v31  ;;  %v1059_v40 = vmul.f32 0.2, %v993_v32  ;;  %1171 = vmatpush1.bf16.msra.mxu0 %v1150_v18  ;;  %1212 = vmatpush1.bf16.msra.mxu1 %v1152_v19  ;;  %v1117_v43 = vmax.f32 %v876_v20, %v1053_v29  ;;  %v1119_v44 = vmax.f32 %v989_v21, %v1055_v30 }
 0x223   : > { %v1058_v41 = vmul.f32 0.2, %v882_v37  ;;  %v1060_v42 = vmul.f32 0.2, %v995_v38  ;;  %v1118_v47 = vmax.f32 %v878_v24, %v1054_v35  ;;  %v1120_v48 = vmax.f32 %v991_v25, %v1056_v36 }
 0x224   : > { %v1121_v45 = vmax.f32 %v880_v31, %v1057_v39  ;;  %v1123_v46 = vmax.f32 %v993_v32, %v1059_v40  ;;  %v1461_v21 = vmov 1966171168   ;;  %v1277_v23 = vlaneseq }
 0x225   : > { %v1122_v49 = vmax.f32 %v882_v37, %v1058_v41  ;;  %v1124_v50 = vmax.f32 %v995_v38, %v1060_v42  ;;  %v1275_v22 = vunpack.c.l.s4 %v1461_v21 }
 0x226   : > { %v1154_v51 = vpack.c.bf16 %v1121_v45, %v1117_v43  ;;  %v1156_v52 = vpack.c.bf16 %v1123_v46, %v1119_v44  ;;  %v1278_v25 = vshrl.u32 %v1277_v23, 7  ;;  %vm1299_vm3 = vcmp.lt.s32.totalorder %v1277_v23, 512 }
 0x227   : > { %v1155_v53 = vpack.c.bf16 %v1122_v49, %v1118_v47  ;;  %v1157_v54 = vpack.c.bf16 %v1124_v50, %v1120_v48  ;;  %v1276_v24 = vunpack.c.0.s8 %v1275_v22 }
 0x229   : > { %1172 = vmatprep.subr.bf16.mxu0 %v1155_v53  ;;  %1213 = vmatprep.subr.bf16.mxu1 %v1157_v54  ;;  %v1279_v27 = vsub.s32 %v1276_v24, %v1278_v25 }
 0x22a   : > { %1173 = vmatpush1.bf16.msra.mxu0 %v1154_v51  ;;  %1214 = vmatpush1.bf16.msra.mxu1 %v1156_v52 }
 0x22d   : > { %1191 = vmatmul.mubr.bf16.vlgmr.msra.gmra.mrb[48].mxu0 %v1125_v55  ;;  %1232 = vmatmul.mubr.bf16.vlgmr.msra.gmra.mrb[48].mxu1 %v1125_v55 }
 0x300   : > { %v1192_v56 = vpop.f32.mrb[48].mxu0  ;;  %v1233_v57 = vpop.f32.mrb[48].mxu1 }
 0x301   : > { %v1402_v58 = vclamps-f32 %v1192_v56, 30.0  ;;  %v1404_v59 = vclamps-f32 %v1233_v57, 30.0  ;;  %v1194_v60 = vpop.f32.mrb[49].mxu0  ;;  %v1235_v61 = vpop.f32.mrb[49].mxu1 }
 0x302   : > { %v1403_v62 = vclamps-f32 %v1194_v60, 30.0  ;;  %v1405_v63 = vclamps-f32 %v1235_v61, 30.0  ;;  %v1196_v1 = vpop.f32.mrb[50].mxu0  ;;  %v1237_v2 = vpop.f32.mrb[50].mxu1 }
 0x303   : > { %v1248_v3 = vsub.f32 0.0, %v1402_v58  ;;  %v1250_v4 = vsub.f32 0.0, %v1404_v59  ;;  %v1197_v5 = vpop.f32.mrb[51].mxu0  ;;  %v1238_v6 = vpop.f32.mrb[51].mxu1 }
 0x304   : > { %v1249_v7 = vsub.f32 0.0, %v1403_v62  ;;  %v1251_v8 = vsub.f32 0.0, %v1405_v63 }
 0x305   : > { %v1252_v9 = vmul.f32 1.442695, %v1248_v3  ;;  %v1256_v10 = vmul.f32 1.442695, %v1250_v4 }
 0x306   : > { %v1254_v11 = vmul.f32 1.442695, %v1249_v7  ;;  %v1258_v12 = vmul.f32 1.442695, %v1251_v8 }
 0x307   : > { %1436 = vpow2.f32 %v1252_v9 }
 0x308   : > { %1438 = vpow2.f32 %v1256_v10 }
 0x309   : > { %1440 = vpow2.f32 %v1254_v11 }
 0x30a   : > { %1442 = vpow2.f32 %v1258_v12 }
 0x311   : > { %v1437_v13 = vpop.eup %1436 }
 0x312   : > { %v1439_v14 = vpop.eup %1438  ;;  %v1260_v15 = vadd.f32 1.0, %v1437_v13 }
 0x313   : > { %v1441_v16 = vpop.eup %1440  ;;  %v1262_v17 = vadd.f32 1.0, %v1439_v14 }
 0x314   : > { %v1443_v18 = vpop.eup %1442  ;;  %1444 = vrcp.f32 %v1260_v15  ;;  %v1261_v19 = vadd.f32 1.0, %v1441_v16 }
 0x315   : > { %1446 = vrcp.f32 %v1262_v17  ;;  %v1263_v20 = vadd.f32 1.0, %v1443_v18 }
 0x316   : > { %1448 = vrcp.f32 %v1261_v19 }
 0x317   : > { %1450 = vrcp.f32 %v1263_v20 }
 0x31e   : > { %v1445_v26 = vpop.eup %1444 }
 0x31f   : > { %v1447_v0 = vpop.eup %1446 }
 0x320   : > { %v1449_v28 = vpop.eup %1448 }
 0x321   : > { %v1451_v29 = vpop.eup %1450  ;;  %v1272_v30 = vcombine.low %v1445_v26, %v1449_v28 }
 0x322   : > { %v1273_v31 = vcombine.low %v1447_v0, %v1451_v29 }
 0x323   : > { %v1280_v32 = vrot.slane %v1272_v30, %v1279_v27 }
 0x324   : > { %v1287_v33 = vrot.slane %v1273_v31, %v1279_v27 }
 0x326   : > { %v1288_v34 = vcombine.low %v1280_v32, %v1287_v33 }
 0x328   : > { %v1295_v35 = vrot.slane %v1288_v34, %v1279_v27 }
 0x32a   : > { %1301 = vst.msk [vmem:[%s251_s14] sm:$0xf] %vm1299_vm3, %v1295_v35 }
 0x32b PF: > { %s16_s21 = sadd.s32 1, %s1458_s21  }
 0x32c   : > { %p13_p4 = scmp.ge.s32.totalorder %s16_s21, 4  }
 0x32e   :  { %15 = sbr.rel (!%p13_p4) target bundleno = 1 (0x1), region = 74 }

</bundles_post_ra>
